<compile_context>
chip_gen: v5e
topology: v5e:2x2
jax: 0.10.0
libtpu: 0.0.40
codegen_flags: <defaults>
</compile_context>

<pallas_src>
import functools

import jax
import jax.numpy as jnp
from jax import lax
from jax.experimental import pallas as pl
from jax.experimental.pallas import tpu as pltpu


def _conv3x3x3_lrelu_kernel(alpha, W, tile_d, x_ref, w_ref, m_ref, b_ref, o_ref):
    """One grid step = one (batch, depth-slab).

    x_ref : (Cin, D, H*W)        full per-sample volume (resident across slabs)
    w_ref : (Cout, 27*Cin)       taps concatenated along K, order (kh, kw, kd, cin)
    m_ref : (9, H*W)             f32 h/w boundary masks per (kh, kw) tap
    b_ref : (Cout, 1)            f32 bias
    o_ref : (Cout, tile_d*H*W)   output depth-slab in final layout
    """
    cin, D, HW = x_ref.shape
    md = pl.program_id(1)
    nd = pl.num_programs(1)
    d0 = md * tile_d

    # Load the tile_d + 2 input depth planes this slab needs (1-plane halo each
    # side).  Halo planes outside the volume are zeroed via a 0/1 scalar, which
    # implements the conv's depth zero-padding.
    planes = []
    for p in range(tile_d + 2):
        dg = d0 + (p - 1)
        if p == 0:
            idx = jnp.maximum(dg, 0)
        elif p == tile_d + 1:
            idx = jnp.minimum(dg, D - 1)
        else:
            idx = dg
        plane = x_ref[:, pl.ds(idx, 1), :].reshape(cin, HW)
        if p == 0:
            plane = plane * (md > 0).astype(plane.dtype)
        elif p == tile_d + 1:
            plane = plane * (md < nd - 1).astype(plane.dtype)
        planes.append(plane)

    for dl in range(tile_d):
        # (3*Cin, HW): the three input planes (kd = 0,1,2) feeding output plane dl.
        p3 = jnp.concatenate(planes[dl:dl + 3], axis=0)
        pieces = []
        for ti in range(9):                       # (kh, kw) taps
            dh = ti // 3 - 1
            dw = ti % 3 - 1
            sh = dh * W + dw
            sp = p3 if sh == 0 else jnp.roll(p3, -sh, axis=1)     # lane roll (XLU)
            pieces.append(sp * m_ref[ti:ti + 1, :])               # zero h/w padding
        cols = jnp.concatenate(pieces, axis=0)    # (27*Cin, HW) in-register im2col

        acc = jnp.dot(w_ref[...], cols, preferred_element_type=jnp.float32)
        acc = acc + b_ref[...]
        out = jnp.where(acc >= 0.0, acc, alpha * acc)             # LeakyReLU
        o_ref[:, dl * HW:(dl + 1) * HW] = out.astype(o_ref.dtype)


def _pick_tile_d(D, HW, min_rows=256):
    """Largest slab count nd (divisor of D) whose slab still has >= min_rows
    output rows and keeps the output block lane-aligned (tile_d*HW % 128 == 0
    unless tile_d == D)."""
    cands = []
    for nd in range(1, D + 1):
        if D % nd:
            continue
        td = D // nd
        if td != D and (td * HW) % 128 != 0:
            continue
        cands.append((nd, td))
    good = [c for c in cands if c[1] * HW >= min_rows]
    pick = max(good, key=lambda c: c[0]) if good else max(cands, key=lambda c: c[1] * HW)
    return pick[1]


def conv_block_forward(x, weight, bias, *, alpha=0.1, tile_d=None):
    """x: (N, Cin, D, H, W); weight: (Cout, Cin, 3, 3, 3); bias: (Cout,)."""
    N, Cin, D, H, W = x.shape
    Cout, Cin_w, kD, kH, kW = weight.shape
    assert Cin_w == Cin
    assert (kD, kH, kW) == (3, 3, 3), "kernel specialised to 3x3x3, stride 1, pad 1"
    HW = H * W

    if tile_d is None:
        tile_d = _pick_tile_d(D, HW)
    assert D % tile_d == 0
    nd = D // tile_d

    # ---- host side: free reshapes + tiny parameter prep only (no data staging) ----
    x_r = x.reshape(N, Cin, D, HW).astype(jnp.float32)

    # K ordering = ((kh*3 + kw)*3 + kd)*Cin + cin — must match the kernel's cols.
    wk = jnp.transpose(weight.astype(jnp.float32), (0, 3, 4, 2, 1)).reshape(Cout, 27 * Cin)
    b2 = bias.astype(jnp.float32).reshape(Cout, 1)

    # (9, H*W) masks: zero where h+dh or w+dw falls outside the volume (padding=1).
    hh = jnp.arange(H).reshape(H, 1)
    ww = jnp.arange(W).reshape(1, W)
    mrows = []
    for ti in range(9):
        dh = ti // 3 - 1
        dw = ti % 3 - 1
        m = (hh + dh >= 0) & (hh + dh < H) & (ww + dw >= 0) & (ww + dw < W)
        mrows.append(m.astype(jnp.float32).reshape(HW))
    mask9 = jnp.stack(mrows, axis=0)

    kernel = functools.partial(_conv3x3x3_lrelu_kernel, alpha, W, tile_d)

    out = pl.pallas_call(
        kernel,
        out_shape=jax.ShapeDtypeStruct((N, Cout, D * HW), x.dtype),
        grid_spec=pltpu.PrefetchScalarGridSpec(
            num_scalar_prefetch=0,
            grid=(N, nd),
            in_specs=[
                # full per-sample volume, resident across the slab axis
                pl.BlockSpec((None, Cin, D, HW), lambda n, md: (n, 0, 0, 0)),
                # weights / masks / bias stay resident across the whole grid
                pl.BlockSpec((Cout, 27 * Cin), lambda n, md: (0, 0)),
                pl.BlockSpec((9, HW), lambda n, md: (0, 0)),
                pl.BlockSpec((Cout, 1), lambda n, md: (0, 0)),
            ],
            out_specs=pl.BlockSpec((None, Cout, tile_d * HW),
                                   lambda n, md: (n, 0, md)),
        ),
        compiler_params=pltpu.CompilerParams(
            dimension_semantics=("parallel", "arbitrary"),  # batches across TCs
            vmem_limit_bytes=32 * 1024 * 1024,              # actual use ~100 KB
        ),
    )(x_r, wk, mask9, b2)

    # (N, Cout, D*H*W) -> (N, Cout, D, H, W): free reshape, no transpose pass.
    return out.reshape(N, Cout, D, H, W)


if __name__ == "__main__":
    key = jax.random.PRNGKey(0)
    k_x, k_w, k_b = jax.random.split(key, 3)

    N, Cin, Cout, D, H, W = 2, 4, 8, 8, 8, 8
    alpha = 0.1

    x = jax.random.normal(k_x, (N, Cin, D, H, W), dtype=jnp.float32)
    # deterministic synthetic parameters (shapes from nn.Conv3d(Cin, Cout, 3, 1, 1))
    weight = 0.1 * jax.random.normal(k_w, (Cout, Cin, 3, 3, 3), dtype=jnp.float32)
    bias = 0.1 * jax.random.normal(k_b, (Cout,), dtype=jnp.float32)

    y = jax.block_until_ready(conv_block_forward(x, weight, bias, alpha=alpha))
    assert y.shape == (N, Cout, D, H, W)

    # reference: XLA conv + leaky relu (same semantics as the PyTorch module)
    ref = lax.conv_general_dilated(
        x, weight, window_strides=(1, 1, 1),
        padding=((1, 1), (1, 1), (1, 1)),
        dimension_numbers=("NCDHW", "OIDHW", "NCDHW"),
        precision=lax.Precision.HIGHEST)
    ref = ref + bias.reshape(1, -1, 1, 1, 1)
    ref = jnp.where(ref >= 0, ref, alpha * ref)

    max_err = float(jnp.max(jnp.abs(y - ref)))
    assert jnp.allclose(y, ref, atol=1e-2, rtol=1e-2), max_err

    print("KERNEL_OK")
</pallas_src>

<mosaic_0001>
module attributes {stable_mosaic.version = 11 : i64} {
  func.func @_conv3x3x3_lrelu_kernel(%arg0: i32, %arg1: i32, %arg2: memref<1x4x8x64xf32, #tpu.memory_space<vmem>>, %arg3: memref<8x108xf32, #tpu.memory_space<vmem>>, %arg4: memref<9x64xf32, #tpu.memory_space<vmem>>, %arg5: memref<8x1xf32, #tpu.memory_space<vmem>>, %arg6: memref<1x8x256xf32, #tpu.memory_space<vmem>>) attributes {dimension_semantics = [#tpu.dimension_semantics<parallel>, #tpu.dimension_semantics<arbitrary>], iteration_bounds = array<i64: 2, 2>, scalar_prefetch = 0 : i64, scratch_operands = 0 : i64, tpu.core_type = #tpu.core_type<tc>, window_params = [{transform_indices = @transform_0, window_bounds = array<i64: 1, 4, 8, 64>}, {pipeline_mode = #tpu.pipeline_mode<synchronous>, transform_indices = @transform_1, window_bounds = array<i64: 8, 108>}, {pipeline_mode = #tpu.pipeline_mode<synchronous>, transform_indices = @transform_2, window_bounds = array<i64: 9, 64>}, {pipeline_mode = #tpu.pipeline_mode<synchronous>, transform_indices = @transform_3, window_bounds = array<i64: 8, 1>}, {transform_indices = @transform_4, window_bounds = array<i64: 1, 8, 256>}]} {
    %c4_i32 = arith.constant 4 : i32
    %0 = arith.muli %arg1, %c4_i32 : i32
    %c-1_i32 = arith.constant -1 : i32
    %1 = arith.addi %0, %c-1_i32 : i32
    %c0_i32 = arith.constant 0 : i32
    %2 = arith.maxsi %1, %c0_i32 : i32
    %c0 = arith.constant 0 : index
    %c0_0 = arith.constant 0 : index
    %3 = arith.index_cast %2 : i32 to index
    %c0_1 = arith.constant 0 : index
    %4 = vector.load %arg2[%c0, %c0_0, %3, %c0_1] : memref<1x4x8x64xf32, #tpu.memory_space<vmem>>, vector<1x4x1x64xf32>
    %5 = vector.shape_cast %4 : vector<1x4x1x64xf32> to vector<4x1x64xf32>
    %6 = vector.shape_cast %5 : vector<4x1x64xf32> to vector<4x64xf32>
    %c0_i32_2 = arith.constant 0 : i32
    %7 = arith.cmpi sgt, %arg1, %c0_i32_2 : i32
    %8 = arith.extui %7 : i1 to i32
    %9 = arith.sitofp %8 : i32 to f32
    %10 = vector.broadcast %9 : f32 to vector<4x64xf32>
    %11 = arith.mulf %6, %10 : vector<4x64xf32>
    %c0_i32_3 = arith.constant 0 : i32
    %12 = arith.addi %0, %c0_i32_3 : i32
    %c0_4 = arith.constant 0 : index
    %c0_5 = arith.constant 0 : index
    %13 = arith.index_cast %12 : i32 to index
    %c0_6 = arith.constant 0 : index
    %14 = vector.load %arg2[%c0_4, %c0_5, %13, %c0_6] : memref<1x4x8x64xf32, #tpu.memory_space<vmem>>, vector<1x4x1x64xf32>
    %15 = vector.shape_cast %14 : vector<1x4x1x64xf32> to vector<4x1x64xf32>
    %16 = vector.shape_cast %15 : vector<4x1x64xf32> to vector<4x64xf32>
    %c1_i32 = arith.constant 1 : i32
    %17 = arith.addi %0, %c1_i32 : i32
    %c0_7 = arith.constant 0 : index
    %c0_8 = arith.constant 0 : index
    %18 = arith.index_cast %17 : i32 to index
    %c0_9 = arith.constant 0 : index
    %19 = vector.load %arg2[%c0_7, %c0_8, %18, %c0_9] : memref<1x4x8x64xf32, #tpu.memory_space<vmem>>, vector<1x4x1x64xf32>
    %20 = vector.shape_cast %19 : vector<1x4x1x64xf32> to vector<4x1x64xf32>
    %21 = vector.shape_cast %20 : vector<4x1x64xf32> to vector<4x64xf32>
    %c2_i32 = arith.constant 2 : i32
    %22 = arith.addi %0, %c2_i32 : i32
    %c0_10 = arith.constant 0 : index
    %c0_11 = arith.constant 0 : index
    %23 = arith.index_cast %22 : i32 to index
    %c0_12 = arith.constant 0 : index
    %24 = vector.load %arg2[%c0_10, %c0_11, %23, %c0_12] : memref<1x4x8x64xf32, #tpu.memory_space<vmem>>, vector<1x4x1x64xf32>
    %25 = vector.shape_cast %24 : vector<1x4x1x64xf32> to vector<4x1x64xf32>
    %26 = vector.shape_cast %25 : vector<4x1x64xf32> to vector<4x64xf32>
    %c3_i32 = arith.constant 3 : i32
    %27 = arith.addi %0, %c3_i32 : i32
    %c0_13 = arith.constant 0 : index
    %c0_14 = arith.constant 0 : index
    %28 = arith.index_cast %27 : i32 to index
    %c0_15 = arith.constant 0 : index
    %29 = vector.load %arg2[%c0_13, %c0_14, %28, %c0_15] : memref<1x4x8x64xf32, #tpu.memory_space<vmem>>, vector<1x4x1x64xf32>
    %30 = vector.shape_cast %29 : vector<1x4x1x64xf32> to vector<4x1x64xf32>
    %31 = vector.shape_cast %30 : vector<4x1x64xf32> to vector<4x64xf32>
    %c4_i32_16 = arith.constant 4 : i32
    %32 = arith.addi %0, %c4_i32_16 : i32
    %c7_i32 = arith.constant 7 : i32
    %33 = arith.minsi %32, %c7_i32 : i32
    %c0_17 = arith.constant 0 : index
    %c0_18 = arith.constant 0 : index
    %34 = arith.index_cast %33 : i32 to index
    %c0_19 = arith.constant 0 : index
    %35 = vector.load %arg2[%c0_17, %c0_18, %34, %c0_19] : memref<1x4x8x64xf32, #tpu.memory_space<vmem>>, vector<1x4x1x64xf32>
    %36 = vector.shape_cast %35 : vector<1x4x1x64xf32> to vector<4x1x64xf32>
    %37 = vector.shape_cast %36 : vector<4x1x64xf32> to vector<4x64xf32>
    %c1_i32_20 = arith.constant 1 : i32
    %38 = arith.cmpi slt, %arg1, %c1_i32_20 : i32
    %39 = arith.extui %38 : i1 to i32
    %40 = arith.sitofp %39 : i32 to f32
    %41 = vector.broadcast %40 : f32 to vector<4x64xf32>
    %42 = arith.mulf %37, %41 : vector<4x64xf32>
    %43 = tpu.concatenate %11, %16, %21 in 0 : vector<4x64xf32>, vector<4x64xf32>, vector<4x64xf32> -> vector<12x64xf32>
    %44 = vector.extract_strided_slice %43 {offsets = [0, 55], sizes = [12, 9], strides = [1, 1]} : vector<12x64xf32> to vector<12x9xf32>
    %45 = vector.extract_strided_slice %43 {offsets = [0, 0], sizes = [12, 55], strides = [1, 1]} : vector<12x64xf32> to vector<12x55xf32>
    %46 = tpu.concatenate %44, %45 in 1 : vector<12x9xf32>, vector<12x55xf32> -> vector<12x64xf32>
    %c0_21 = arith.constant 0 : index
    %c0_22 = arith.constant 0 : index
    %47 = vector.load %arg4[%c0_21, %c0_22] : memref<9x64xf32, #tpu.memory_space<vmem>>, vector<1x64xf32>
    %48 = vector.broadcast %47 : vector<1x64xf32> to vector<12x64xf32>
    %49 = arith.mulf %46, %48 : vector<12x64xf32>
    %50 = vector.extract_strided_slice %43 {offsets = [0, 56], sizes = [12, 8], strides = [1, 1]} : vector<12x64xf32> to vector<12x8xf32>
    %51 = vector.extract_strided_slice %43 {offsets = [0, 0], sizes = [12, 56], strides = [1, 1]} : vector<12x64xf32> to vector<12x56xf32>
    %52 = tpu.concatenate %50, %51 in 1 : vector<12x8xf32>, vector<12x56xf32> -> vector<12x64xf32>
    %c1 = arith.constant 1 : index
    %c0_23 = arith.constant 0 : index
    %53 = vector.load %arg4[%c1, %c0_23] : memref<9x64xf32, #tpu.memory_space<vmem>>, vector<1x64xf32>
    %54 = vector.broadcast %53 : vector<1x64xf32> to vector<12x64xf32>
    %55 = arith.mulf %52, %54 : vector<12x64xf32>
    %56 = vector.extract_strided_slice %43 {offsets = [0, 57], sizes = [12, 7], strides = [1, 1]} : vector<12x64xf32> to vector<12x7xf32>
    %57 = vector.extract_strided_slice %43 {offsets = [0, 0], sizes = [12, 57], strides = [1, 1]} : vector<12x64xf32> to vector<12x57xf32>
    %58 = tpu.concatenate %56, %57 in 1 : vector<12x7xf32>, vector<12x57xf32> -> vector<12x64xf32>
    %c2 = arith.constant 2 : index
    %c0_24 = arith.constant 0 : index
    %59 = vector.load %arg4[%c2, %c0_24] : memref<9x64xf32, #tpu.memory_space<vmem>>, vector<1x64xf32>
    %60 = vector.broadcast %59 : vector<1x64xf32> to vector<12x64xf32>
    %61 = arith.mulf %58, %60 : vector<12x64xf32>
    %62 = vector.extract_strided_slice %43 {offsets = [0, 63], sizes = [12, 1], strides = [1, 1]} : vector<12x64xf32> to vector<12x1xf32>
    %63 = vector.extract_strided_slice %43 {offsets = [0, 0], sizes = [12, 63], strides = [1, 1]} : vector<12x64xf32> to vector<12x63xf32>
    %64 = tpu.concatenate %62, %63 in 1 : vector<12x1xf32>, vector<12x63xf32> -> vector<12x64xf32>
    %c3 = arith.constant 3 : index
    %c0_25 = arith.constant 0 : index
    %65 = vector.load %arg4[%c3, %c0_25] : memref<9x64xf32, #tpu.memory_space<vmem>>, vector<1x64xf32>
    %66 = vector.broadcast %65 : vector<1x64xf32> to vector<12x64xf32>
    %67 = arith.mulf %64, %66 : vector<12x64xf32>
    %c4 = arith.constant 4 : index
    %c0_26 = arith.constant 0 : index
    %68 = vector.load %arg4[%c4, %c0_26] : memref<9x64xf32, #tpu.memory_space<vmem>>, vector<1x64xf32>
    %69 = vector.broadcast %68 : vector<1x64xf32> to vector<12x64xf32>
    %70 = arith.mulf %43, %69 : vector<12x64xf32>
    %71 = vector.extract_strided_slice %43 {offsets = [0, 1], sizes = [12, 63], strides = [1, 1]} : vector<12x64xf32> to vector<12x63xf32>
    %72 = vector.extract_strided_slice %43 {offsets = [0, 0], sizes = [12, 1], strides = [1, 1]} : vector<12x64xf32> to vector<12x1xf32>
    %73 = tpu.concatenate %71, %72 in 1 : vector<12x63xf32>, vector<12x1xf32> -> vector<12x64xf32>
    %c5 = arith.constant 5 : index
    %c0_27 = arith.constant 0 : index
    %74 = vector.load %arg4[%c5, %c0_27] : memref<9x64xf32, #tpu.memory_space<vmem>>, vector<1x64xf32>
    %75 = vector.broadcast %74 : vector<1x64xf32> to vector<12x64xf32>
    %76 = arith.mulf %73, %75 : vector<12x64xf32>
    %77 = vector.extract_strided_slice %43 {offsets = [0, 7], sizes = [12, 57], strides = [1, 1]} : vector<12x64xf32> to vector<12x57xf32>
    %78 = vector.extract_strided_slice %43 {offsets = [0, 0], sizes = [12, 7], strides = [1, 1]} : vector<12x64xf32> to vector<12x7xf32>
    %79 = tpu.concatenate %77, %78 in 1 : vector<12x57xf32>, vector<12x7xf32> -> vector<12x64xf32>
    %c6 = arith.constant 6 : index
    %c0_28 = arith.constant 0 : index
    %80 = vector.load %arg4[%c6, %c0_28] : memref<9x64xf32, #tpu.memory_space<vmem>>, vector<1x64xf32>
    %81 = vector.broadcast %80 : vector<1x64xf32> to vector<12x64xf32>
    %82 = arith.mulf %79, %81 : vector<12x64xf32>
    %83 = vector.extract_strided_slice %43 {offsets = [0, 8], sizes = [12, 56], strides = [1, 1]} : vector<12x64xf32> to vector<12x56xf32>
    %84 = vector.extract_strided_slice %43 {offsets = [0, 0], sizes = [12, 8], strides = [1, 1]} : vector<12x64xf32> to vector<12x8xf32>
    %85 = tpu.concatenate %83, %84 in 1 : vector<12x56xf32>, vector<12x8xf32> -> vector<12x64xf32>
    %c7 = arith.constant 7 : index
    %c0_29 = arith.constant 0 : index
    %86 = vector.load %arg4[%c7, %c0_29] : memref<9x64xf32, #tpu.memory_space<vmem>>, vector<1x64xf32>
    %87 = vector.broadcast %86 : vector<1x64xf32> to vector<12x64xf32>
    %88 = arith.mulf %85, %87 : vector<12x64xf32>
    %89 = vector.extract_strided_slice %43 {offsets = [0, 9], sizes = [12, 55], strides = [1, 1]} : vector<12x64xf32> to vector<12x55xf32>
    %90 = vector.extract_strided_slice %43 {offsets = [0, 0], sizes = [12, 9], strides = [1, 1]} : vector<12x64xf32> to vector<12x9xf32>
    %91 = tpu.concatenate %89, %90 in 1 : vector<12x55xf32>, vector<12x9xf32> -> vector<12x64xf32>
    %c8 = arith.constant 8 : index
    %c0_30 = arith.constant 0 : index
    %92 = vector.load %arg4[%c8, %c0_30] : memref<9x64xf32, #tpu.memory_space<vmem>>, vector<1x64xf32>
    %93 = vector.broadcast %92 : vector<1x64xf32> to vector<12x64xf32>
    %94 = arith.mulf %91, %93 : vector<12x64xf32>
    %95 = tpu.concatenate %49, %55, %61, %67, %70, %76, %82, %88, %94 in 0 : vector<12x64xf32>, vector<12x64xf32>, vector<12x64xf32>, vector<12x64xf32>, vector<12x64xf32>, vector<12x64xf32>, vector<12x64xf32>, vector<12x64xf32>, vector<12x64xf32> -> vector<108x64xf32>
    %c0_31 = arith.constant 0 : index
    %c0_32 = arith.constant 0 : index
    %96 = vector.load %arg3[%c0_31, %c0_32] : memref<8x108xf32, #tpu.memory_space<vmem>>, vector<8x108xf32>
    %cst = arith.constant dense<0.000000e+00> : vector<8x64xf32>
    %97 = tpu.matmul %96, %95, %cst {dimension_numbers = #tpu.dot_dimension_numbers<[1], [0], [0], [1], [0, 0, 1, 1], [], []>} : vector<8x108xf32>, vector<108x64xf32>, vector<8x64xf32> -> vector<8x64xf32>
    %c0_33 = arith.constant 0 : index
    %c0_34 = arith.constant 0 : index
    %98 = vector.load %arg5[%c0_33, %c0_34] : memref<8x1xf32, #tpu.memory_space<vmem>>, vector<8x1xf32>
    %99 = vector.broadcast %98 : vector<8x1xf32> to vector<8x64xf32>
    %100 = arith.addf %97, %99 : vector<8x64xf32>
    %cst_35 = arith.constant 0.000000e+00 : f32
    %101 = vector.broadcast %cst_35 : f32 to vector<8x64xf32>
    %102 = arith.cmpf oge, %100, %101 : vector<8x64xf32>
    %cst_36 = arith.constant 1.000000e-01 : f32
    %103 = vector.broadcast %cst_36 : f32 to vector<8x64xf32>
    %104 = arith.mulf %103, %100 : vector<8x64xf32>
    %105 = arith.select %102, %100, %104 : vector<8x64xi1>, vector<8x64xf32>
    %c0_37 = arith.constant 0 : index
    %c0_38 = arith.constant 0 : index
    %c0_39 = arith.constant 0 : index
    %106 = vector.load %arg6[%c0_37, %c0_38, %c0_39] : memref<1x8x256xf32, #tpu.memory_space<vmem>>, vector<1x8x64xf32>
    %107 = vector.shape_cast %106 : vector<1x8x64xf32> to vector<8x64xf32>
    %108 = vector.shape_cast %105 : vector<8x64xf32> to vector<1x8x64xf32>
    tpu.vector_store %arg6[%c0_37, %c0_38, %c0_39], %108 {strides = array<i32>} : memref<1x8x256xf32, #tpu.memory_space<vmem>>, vector<1x8x64xf32>,
    %109 = tpu.concatenate %16, %21, %26 in 0 : vector<4x64xf32>, vector<4x64xf32>, vector<4x64xf32> -> vector<12x64xf32>
    %110 = vector.extract_strided_slice %109 {offsets = [0, 55], sizes = [12, 9], strides = [1, 1]} : vector<12x64xf32> to vector<12x9xf32>
    %111 = vector.extract_strided_slice %109 {offsets = [0, 0], sizes = [12, 55], strides = [1, 1]} : vector<12x64xf32> to vector<12x55xf32>
    %112 = tpu.concatenate %110, %111 in 1 : vector<12x9xf32>, vector<12x55xf32> -> vector<12x64xf32>
    %c0_40 = arith.constant 0 : index
    %c0_41 = arith.constant 0 : index
    %113 = vector.load %arg4[%c0_40, %c0_41] : memref<9x64xf32, #tpu.memory_space<vmem>>, vector<1x64xf32>
    %114 = vector.broadcast %113 : vector<1x64xf32> to vector<12x64xf32>
    %115 = arith.mulf %112, %114 : vector<12x64xf32>
    %116 = vector.extract_strided_slice %109 {offsets = [0, 56], sizes = [12, 8], strides = [1, 1]} : vector<12x64xf32> to vector<12x8xf32>
    %117 = vector.extract_strided_slice %109 {offsets = [0, 0], sizes = [12, 56], strides = [1, 1]} : vector<12x64xf32> to vector<12x56xf32>
    %118 = tpu.concatenate %116, %117 in 1 : vector<12x8xf32>, vector<12x56xf32> -> vector<12x64xf32>
    %c1_42 = arith.constant 1 : index
    %c0_43 = arith.constant 0 : index
    %119 = vector.load %arg4[%c1_42, %c0_43] : memref<9x64xf32, #tpu.memory_space<vmem>>, vector<1x64xf32>
    %120 = vector.broadcast %119 : vector<1x64xf32> to vector<12x64xf32>
    %121 = arith.mulf %118, %120 : vector<12x64xf32>
    %122 = vector.extract_strided_slice %109 {offsets = [0, 57], sizes = [12, 7], strides = [1, 1]} : vector<12x64xf32> to vector<12x7xf32>
    %123 = vector.extract_strided_slice %109 {offsets = [0, 0], sizes = [12, 57], strides = [1, 1]} : vector<12x64xf32> to vector<12x57xf32>
    %124 = tpu.concatenate %122, %123 in 1 : vector<12x7xf32>, vector<12x57xf32> -> vector<12x64xf32>
    %c2_44 = arith.constant 2 : index
    %c0_45 = arith.constant 0 : index
    %125 = vector.load %arg4[%c2_44, %c0_45] : memref<9x64xf32, #tpu.memory_space<vmem>>, vector<1x64xf32>
    %126 = vector.broadcast %125 : vector<1x64xf32> to vector<12x64xf32>
    %127 = arith.mulf %124, %126 : vector<12x64xf32>
    %128 = vector.extract_strided_slice %109 {offsets = [0, 63], sizes = [12, 1], strides = [1, 1]} : vector<12x64xf32> to vector<12x1xf32>
    %129 = vector.extract_strided_slice %109 {offsets = [0, 0], sizes = [12, 63], strides = [1, 1]} : vector<12x64xf32> to vector<12x63xf32>
    %130 = tpu.concatenate %128, %129 in 1 : vector<12x1xf32>, vector<12x63xf32> -> vector<12x64xf32>
    %c3_46 = arith.constant 3 : index
    %c0_47 = arith.constant 0 : index
    %131 = vector.load %arg4[%c3_46, %c0_47] : memref<9x64xf32, #tpu.memory_space<vmem>>, vector<1x64xf32>
    %132 = vector.broadcast %131 : vector<1x64xf32> to vector<12x64xf32>
    %133 = arith.mulf %130, %132 : vector<12x64xf32>
    %c4_48 = arith.constant 4 : index
    %c0_49 = arith.constant 0 : index
    %134 = vector.load %arg4[%c4_48, %c0_49] : memref<9x64xf32, #tpu.memory_space<vmem>>, vector<1x64xf32>
    %135 = vector.broadcast %134 : vector<1x64xf32> to vector<12x64xf32>
    %136 = arith.mulf %109, %135 : vector<12x64xf32>
    %137 = vector.extract_strided_slice %109 {offsets = [0, 1], sizes = [12, 63], strides = [1, 1]} : vector<12x64xf32> to vector<12x63xf32>
    %138 = vector.extract_strided_slice %109 {offsets = [0, 0], sizes = [12, 1], strides = [1, 1]} : vector<12x64xf32> to vector<12x1xf32>
    %139 = tpu.concatenate %137, %138 in 1 : vector<12x63xf32>, vector<12x1xf32> -> vector<12x64xf32>
    %c5_50 = arith.constant 5 : index
    %c0_51 = arith.constant 0 : index
    %140 = vector.load %arg4[%c5_50, %c0_51] : memref<9x64xf32, #tpu.memory_space<vmem>>, vector<1x64xf32>
    %141 = vector.broadcast %140 : vector<1x64xf32> to vector<12x64xf32>
    %142 = arith.mulf %139, %141 : vector<12x64xf32>
    %143 = vector.extract_strided_slice %109 {offsets = [0, 7], sizes = [12, 57], strides = [1, 1]} : vector<12x64xf32> to vector<12x57xf32>
    %144 = vector.extract_strided_slice %109 {offsets = [0, 0], sizes = [12, 7], strides = [1, 1]} : vector<12x64xf32> to vector<12x7xf32>
    %145 = tpu.concatenate %143, %144 in 1 : vector<12x57xf32>, vector<12x7xf32> -> vector<12x64xf32>
    %c6_52 = arith.constant 6 : index
    %c0_53 = arith.constant 0 : index
    %146 = vector.load %arg4[%c6_52, %c0_53] : memref<9x64xf32, #tpu.memory_space<vmem>>, vector<1x64xf32>
    %147 = vector.broadcast %146 : vector<1x64xf32> to vector<12x64xf32>
    %148 = arith.mulf %145, %147 : vector<12x64xf32>
    %149 = vector.extract_strided_slice %109 {offsets = [0, 8], sizes = [12, 56], strides = [1, 1]} : vector<12x64xf32> to vector<12x56xf32>
    %150 = vector.extract_strided_slice %109 {offsets = [0, 0], sizes = [12, 8], strides = [1, 1]} : vector<12x64xf32> to vector<12x8xf32>
    %151 = tpu.concatenate %149, %150 in 1 : vector<12x56xf32>, vector<12x8xf32> -> vector<12x64xf32>
    %c7_54 = arith.constant 7 : index
    %c0_55 = arith.constant 0 : index
    %152 = vector.load %arg4[%c7_54, %c0_55] : memref<9x64xf32, #tpu.memory_space<vmem>>, vector<1x64xf32>
    %153 = vector.broadcast %152 : vector<1x64xf32> to vector<12x64xf32>
    %154 = arith.mulf %151, %153 : vector<12x64xf32>
    %155 = vector.extract_strided_slice %109 {offsets = [0, 9], sizes = [12, 55], strides = [1, 1]} : vector<12x64xf32> to vector<12x55xf32>
    %156 = vector.extract_strided_slice %109 {offsets = [0, 0], sizes = [12, 9], strides = [1, 1]} : vector<12x64xf32> to vector<12x9xf32>
    %157 = tpu.concatenate %155, %156 in 1 : vector<12x55xf32>, vector<12x9xf32> -> vector<12x64xf32>
    %c8_56 = arith.constant 8 : index
    %c0_57 = arith.constant 0 : index
    %158 = vector.load %arg4[%c8_56, %c0_57] : memref<9x64xf32, #tpu.memory_space<vmem>>, vector<1x64xf32>
    %159 = vector.broadcast %158 : vector<1x64xf32> to vector<12x64xf32>
    %160 = arith.mulf %157, %159 : vector<12x64xf32>
    %161 = tpu.concatenate %115, %121, %127, %133, %136, %142, %148, %154, %160 in 0 : vector<12x64xf32>, vector<12x64xf32>, vector<12x64xf32>, vector<12x64xf32>, vector<12x64xf32>, vector<12x64xf32>, vector<12x64xf32>, vector<12x64xf32>, vector<12x64xf32> -> vector<108x64xf32>
    %c0_58 = arith.constant 0 : index
    %c0_59 = arith.constant 0 : index
    %162 = vector.load %arg3[%c0_58, %c0_59] : memref<8x108xf32, #tpu.memory_space<vmem>>, vector<8x108xf32>
    %cst_60 = arith.constant dense<0.000000e+00> : vector<8x64xf32>
    %163 = tpu.matmul %162, %161, %cst_60 {dimension_numbers = #tpu.dot_dimension_numbers<[1], [0], [0], [1], [0, 0, 1, 1], [], []>} : vector<8x108xf32>, vector<108x64xf32>, vector<8x64xf32> -> vector<8x64xf32>
    %c0_61 = arith.constant 0 : index
    %c0_62 = arith.constant 0 : index
    %164 = vector.load %arg5[%c0_61, %c0_62] : memref<8x1xf32, #tpu.memory_space<vmem>>, vector<8x1xf32>
    %165 = vector.broadcast %164 : vector<8x1xf32> to vector<8x64xf32>
    %166 = arith.addf %163, %165 : vector<8x64xf32>
    %cst_63 = arith.constant 0.000000e+00 : f32
    %167 = vector.broadcast %cst_63 : f32 to vector<8x64xf32>
    %168 = arith.cmpf oge, %166, %167 : vector<8x64xf32>
    %cst_64 = arith.constant 1.000000e-01 : f32
    %169 = vector.broadcast %cst_64 : f32 to vector<8x64xf32>
    %170 = arith.mulf %169, %166 : vector<8x64xf32>
    %171 = arith.select %168, %166, %170 : vector<8x64xi1>, vector<8x64xf32>
    %c0_65 = arith.constant 0 : index
    %c0_66 = arith.constant 0 : index
    %c64 = arith.constant 64 : index
    %172 = vector.load %arg6[%c0_65, %c0_66, %c64] : memref<1x8x256xf32, #tpu.memory_space<vmem>>, vector<1x8x64xf32>
    %173 = vector.shape_cast %172 : vector<1x8x64xf32> to vector<8x64xf32>
    %174 = vector.shape_cast %171 : vector<8x64xf32> to vector<1x8x64xf32>
    tpu.vector_store %arg6[%c0_65, %c0_66, %c64], %174 {strides = array<i32>} : memref<1x8x256xf32, #tpu.memory_space<vmem>>, vector<1x8x64xf32>,
    %175 = tpu.concatenate %21, %26, %31 in 0 : vector<4x64xf32>, vector<4x64xf32>, vector<4x64xf32> -> vector<12x64xf32>
    %176 = vector.extract_strided_slice %175 {offsets = [0, 55], sizes = [12, 9], strides = [1, 1]} : vector<12x64xf32> to vector<12x9xf32>
    %177 = vector.extract_strided_slice %175 {offsets = [0, 0], sizes = [12, 55], strides = [1, 1]} : vector<12x64xf32> to vector<12x55xf32>
    %178 = tpu.concatenate %176, %177 in 1 : vector<12x9xf32>, vector<12x55xf32> -> vector<12x64xf32>
    %c0_67 = arith.constant 0 : index
    %c0_68 = arith.constant 0 : index
    %179 = vector.load %arg4[%c0_67, %c0_68] : memref<9x64xf32, #tpu.memory_space<vmem>>, vector<1x64xf32>
    %180 = vector.broadcast %179 : vector<1x64xf32> to vector<12x64xf32>
    %181 = arith.mulf %178, %180 : vector<12x64xf32>
    %182 = vector.extract_strided_slice %175 {offsets = [0, 56], sizes = [12, 8], strides = [1, 1]} : vector<12x64xf32> to vector<12x8xf32>
    %183 = vector.extract_strided_slice %175 {offsets = [0, 0], sizes = [12, 56], strides = [1, 1]} : vector<12x64xf32> to vector<12x56xf32>
    %184 = tpu.concatenate %182, %183 in 1 : vector<12x8xf32>, vector<12x56xf32> -> vector<12x64xf32>
    %c1_69 = arith.constant 1 : index
    %c0_70 = arith.constant 0 : index
    %185 = vector.load %arg4[%c1_69, %c0_70] : memref<9x64xf32, #tpu.memory_space<vmem>>, vector<1x64xf32>
    %186 = vector.broadcast %185 : vector<1x64xf32> to vector<12x64xf32>
    %187 = arith.mulf %184, %186 : vector<12x64xf32>
    %188 = vector.extract_strided_slice %175 {offsets = [0, 57], sizes = [12, 7], strides = [1, 1]} : vector<12x64xf32> to vector<12x7xf32>
    %189 = vector.extract_strided_slice %175 {offsets = [0, 0], sizes = [12, 57], strides = [1, 1]} : vector<12x64xf32> to vector<12x57xf32>
    %190 = tpu.concatenate %188, %189 in 1 : vector<12x7xf32>, vector<12x57xf32> -> vector<12x64xf32>
    %c2_71 = arith.constant 2 : index
    %c0_72 = arith.constant 0 : index
    %191 = vector.load %arg4[%c2_71, %c0_72] : memref<9x64xf32, #tpu.memory_space<vmem>>, vector<1x64xf32>
    %192 = vector.broadcast %191 : vector<1x64xf32> to vector<12x64xf32>
    %193 = arith.mulf %190, %192 : vector<12x64xf32>
    %194 = vector.extract_strided_slice %175 {offsets = [0, 63], sizes = [12, 1], strides = [1, 1]} : vector<12x64xf32> to vector<12x1xf32>
    %195 = vector.extract_strided_slice %175 {offsets = [0, 0], sizes = [12, 63], strides = [1, 1]} : vector<12x64xf32> to vector<12x63xf32>
    %196 = tpu.concatenate %194, %195 in 1 : vector<12x1xf32>, vector<12x63xf32> -> vector<12x64xf32>
    %c3_73 = arith.constant 3 : index
    %c0_74 = arith.constant 0 : index
    %197 = vector.load %arg4[%c3_73, %c0_74] : memref<9x64xf32, #tpu.memory_space<vmem>>, vector<1x64xf32>
    %198 = vector.broadcast %197 : vector<1x64xf32> to vector<12x64xf32>
    %199 = arith.mulf %196, %198 : vector<12x64xf32>
    %c4_75 = arith.constant 4 : index
    %c0_76 = arith.constant 0 : index
    %200 = vector.load %arg4[%c4_75, %c0_76] : memref<9x64xf32, #tpu.memory_space<vmem>>, vector<1x64xf32>
    %201 = vector.broadcast %200 : vector<1x64xf32> to vector<12x64xf32>
    %202 = arith.mulf %175, %201 : vector<12x64xf32>
    %203 = vector.extract_strided_slice %175 {offsets = [0, 1], sizes = [12, 63], strides = [1, 1]} : vector<12x64xf32> to vector<12x63xf32>
    %204 = vector.extract_strided_slice %175 {offsets = [0, 0], sizes = [12, 1], strides = [1, 1]} : vector<12x64xf32> to vector<12x1xf32>
    %205 = tpu.concatenate %203, %204 in 1 : vector<12x63xf32>, vector<12x1xf32> -> vector<12x64xf32>
    %c5_77 = arith.constant 5 : index
    %c0_78 = arith.constant 0 : index
    %206 = vector.load %arg4[%c5_77, %c0_78] : memref<9x64xf32, #tpu.memory_space<vmem>>, vector<1x64xf32>
    %207 = vector.broadcast %206 : vector<1x64xf32> to vector<12x64xf32>
    %208 = arith.mulf %205, %207 : vector<12x64xf32>
    %209 = vector.extract_strided_slice %175 {offsets = [0, 7], sizes = [12, 57], strides = [1, 1]} : vector<12x64xf32> to vector<12x57xf32>
    %210 = vector.extract_strided_slice %175 {offsets = [0, 0], sizes = [12, 7], strides = [1, 1]} : vector<12x64xf32> to vector<12x7xf32>
    %211 = tpu.concatenate %209, %210 in 1 : vector<12x57xf32>, vector<12x7xf32> -> vector<12x64xf32>
    %c6_79 = arith.constant 6 : index
    %c0_80 = arith.constant 0 : index
    %212 = vector.load %arg4[%c6_79, %c0_80] : memref<9x64xf32, #tpu.memory_space<vmem>>, vector<1x64xf32>
    %213 = vector.broadcast %212 : vector<1x64xf32> to vector<12x64xf32>
    %214 = arith.mulf %211, %213 : vector<12x64xf32>
    %215 = vector.extract_strided_slice %175 {offsets = [0, 8], sizes = [12, 56], strides = [1, 1]} : vector<12x64xf32> to vector<12x56xf32>
    %216 = vector.extract_strided_slice %175 {offsets = [0, 0], sizes = [12, 8], strides = [1, 1]} : vector<12x64xf32> to vector<12x8xf32>
    %217 = tpu.concatenate %215, %216 in 1 : vector<12x56xf32>, vector<12x8xf32> -> vector<12x64xf32>
    %c7_81 = arith.constant 7 : index
    %c0_82 = arith.constant 0 : index
    %218 = vector.load %arg4[%c7_81, %c0_82] : memref<9x64xf32, #tpu.memory_space<vmem>>, vector<1x64xf32>
    %219 = vector.broadcast %218 : vector<1x64xf32> to vector<12x64xf32>
    %220 = arith.mulf %217, %219 : vector<12x64xf32>
    %221 = vector.extract_strided_slice %175 {offsets = [0, 9], sizes = [12, 55], strides = [1, 1]} : vector<12x64xf32> to vector<12x55xf32>
    %222 = vector.extract_strided_slice %175 {offsets = [0, 0], sizes = [12, 9], strides = [1, 1]} : vector<12x64xf32> to vector<12x9xf32>
    %223 = tpu.concatenate %221, %222 in 1 : vector<12x55xf32>, vector<12x9xf32> -> vector<12x64xf32>
    %c8_83 = arith.constant 8 : index
    %c0_84 = arith.constant 0 : index
    %224 = vector.load %arg4[%c8_83, %c0_84] : memref<9x64xf32, #tpu.memory_space<vmem>>, vector<1x64xf32>
    %225 = vector.broadcast %224 : vector<1x64xf32> to vector<12x64xf32>
    %226 = arith.mulf %223, %225 : vector<12x64xf32>
    %227 = tpu.concatenate %181, %187, %193, %199, %202, %208, %214, %220, %226 in 0 : vector<12x64xf32>, vector<12x64xf32>, vector<12x64xf32>, vector<12x64xf32>, vector<12x64xf32>, vector<12x64xf32>, vector<12x64xf32>, vector<12x64xf32>, vector<12x64xf32> -> vector<108x64xf32>
    %c0_85 = arith.constant 0 : index
    %c0_86 = arith.constant 0 : index
    %228 = vector.load %arg3[%c0_85, %c0_86] : memref<8x108xf32, #tpu.memory_space<vmem>>, vector<8x108xf32>
    %cst_87 = arith.constant dense<0.000000e+00> : vector<8x64xf32>
    %229 = tpu.matmul %228, %227, %cst_87 {dimension_numbers = #tpu.dot_dimension_numbers<[1], [0], [0], [1], [0, 0, 1, 1], [], []>} : vector<8x108xf32>, vector<108x64xf32>, vector<8x64xf32> -> vector<8x64xf32>
    %c0_88 = arith.constant 0 : index
    %c0_89 = arith.constant 0 : index
    %230 = vector.load %arg5[%c0_88, %c0_89] : memref<8x1xf32, #tpu.memory_space<vmem>>, vector<8x1xf32>
    %231 = vector.broadcast %230 : vector<8x1xf32> to vector<8x64xf32>
    %232 = arith.addf %229, %231 : vector<8x64xf32>
    %cst_90 = arith.constant 0.000000e+00 : f32
    %233 = vector.broadcast %cst_90 : f32 to vector<8x64xf32>
    %234 = arith.cmpf oge, %232, %233 : vector<8x64xf32>
    %cst_91 = arith.constant 1.000000e-01 : f32
    %235 = vector.broadcast %cst_91 : f32 to vector<8x64xf32>
    %236 = arith.mulf %235, %232 : vector<8x64xf32>
    %237 = arith.select %234, %232, %236 : vector<8x64xi1>, vector<8x64xf32>
    %c0_92 = arith.constant 0 : index
    %c0_93 = arith.constant 0 : index
    %c128 = arith.constant 128 : index
    %238 = vector.load %arg6[%c0_92, %c0_93, %c128] : memref<1x8x256xf32, #tpu.memory_space<vmem>>, vector<1x8x64xf32>
    %239 = vector.shape_cast %238 : vector<1x8x64xf32> to vector<8x64xf32>
    %240 = vector.shape_cast %237 : vector<8x64xf32> to vector<1x8x64xf32>
    tpu.vector_store %arg6[%c0_92, %c0_93, %c128], %240 {strides = array<i32>} : memref<1x8x256xf32, #tpu.memory_space<vmem>>, vector<1x8x64xf32>,
    %241 = tpu.concatenate %26, %31, %42 in 0 : vector<4x64xf32>, vector<4x64xf32>, vector<4x64xf32> -> vector<12x64xf32>
    %242 = vector.extract_strided_slice %241 {offsets = [0, 55], sizes = [12, 9], strides = [1, 1]} : vector<12x64xf32> to vector<12x9xf32>
    %243 = vector.extract_strided_slice %241 {offsets = [0, 0], sizes = [12, 55], strides = [1, 1]} : vector<12x64xf32> to vector<12x55xf32>
    %244 = tpu.concatenate %242, %243 in 1 : vector<12x9xf32>, vector<12x55xf32> -> vector<12x64xf32>
    %c0_94 = arith.constant 0 : index
    %c0_95 = arith.constant 0 : index
    %245 = vector.load %arg4[%c0_94, %c0_95] : memref<9x64xf32, #tpu.memory_space<vmem>>, vector<1x64xf32>
    %246 = vector.broadcast %245 : vector<1x64xf32> to vector<12x64xf32>
    %247 = arith.mulf %244, %246 : vector<12x64xf32>
    %248 = vector.extract_strided_slice %241 {offsets = [0, 56], sizes = [12, 8], strides = [1, 1]} : vector<12x64xf32> to vector<12x8xf32>
    %249 = vector.extract_strided_slice %241 {offsets = [0, 0], sizes = [12, 56], strides = [1, 1]} : vector<12x64xf32> to vector<12x56xf32>
    %250 = tpu.concatenate %248, %249 in 1 : vector<12x8xf32>, vector<12x56xf32> -> vector<12x64xf32>
    %c1_96 = arith.constant 1 : index
    %c0_97 = arith.constant 0 : index
    %251 = vector.load %arg4[%c1_96, %c0_97] : memref<9x64xf32, #tpu.memory_space<vmem>>, vector<1x64xf32>
    %252 = vector.broadcast %251 : vector<1x64xf32> to vector<12x64xf32>
    %253 = arith.mulf %250, %252 : vector<12x64xf32>
    %254 = vector.extract_strided_slice %241 {offsets = [0, 57], sizes = [12, 7], strides = [1, 1]} : vector<12x64xf32> to vector<12x7xf32>
    %255 = vector.extract_strided_slice %241 {offsets = [0, 0], sizes = [12, 57], strides = [1, 1]} : vector<12x64xf32> to vector<12x57xf32>
    %256 = tpu.concatenate %254, %255 in 1 : vector<12x7xf32>, vector<12x57xf32> -> vector<12x64xf32>
    %c2_98 = arith.constant 2 : index
    %c0_99 = arith.constant 0 : index
    %257 = vector.load %arg4[%c2_98, %c0_99] : memref<9x64xf32, #tpu.memory_space<vmem>>, vector<1x64xf32>
    %258 = vector.broadcast %257 : vector<1x64xf32> to vector<12x64xf32>
    %259 = arith.mulf %256, %258 : vector<12x64xf32>
    %260 = vector.extract_strided_slice %241 {offsets = [0, 63], sizes = [12, 1], strides = [1, 1]} : vector<12x64xf32> to vector<12x1xf32>
    %261 = vector.extract_strided_slice %241 {offsets = [0, 0], sizes = [12, 63], strides = [1, 1]} : vector<12x64xf32> to vector<12x63xf32>
    %262 = tpu.concatenate %260, %261 in 1 : vector<12x1xf32>, vector<12x63xf32> -> vector<12x64xf32>
    %c3_100 = arith.constant 3 : index
    %c0_101 = arith.constant 0 : index
    %263 = vector.load %arg4[%c3_100, %c0_101] : memref<9x64xf32, #tpu.memory_space<vmem>>, vector<1x64xf32>
    %264 = vector.broadcast %263 : vector<1x64xf32> to vector<12x64xf32>
    %265 = arith.mulf %262, %264 : vector<12x64xf32>
    %c4_102 = arith.constant 4 : index
    %c0_103 = arith.constant 0 : index
    %266 = vector.load %arg4[%c4_102, %c0_103] : memref<9x64xf32, #tpu.memory_space<vmem>>, vector<1x64xf32>
    %267 = vector.broadcast %266 : vector<1x64xf32> to vector<12x64xf32>
    %268 = arith.mulf %241, %267 : vector<12x64xf32>
    %269 = vector.extract_strided_slice %241 {offsets = [0, 1], sizes = [12, 63], strides = [1, 1]} : vector<12x64xf32> to vector<12x63xf32>
    %270 = vector.extract_strided_slice %241 {offsets = [0, 0], sizes = [12, 1], strides = [1, 1]} : vector<12x64xf32> to vector<12x1xf32>
    %271 = tpu.concatenate %269, %270 in 1 : vector<12x63xf32>, vector<12x1xf32> -> vector<12x64xf32>
    %c5_104 = arith.constant 5 : index
    %c0_105 = arith.constant 0 : index
    %272 = vector.load %arg4[%c5_104, %c0_105] : memref<9x64xf32, #tpu.memory_space<vmem>>, vector<1x64xf32>
    %273 = vector.broadcast %272 : vector<1x64xf32> to vector<12x64xf32>
    %274 = arith.mulf %271, %273 : vector<12x64xf32>
    %275 = vector.extract_strided_slice %241 {offsets = [0, 7], sizes = [12, 57], strides = [1, 1]} : vector<12x64xf32> to vector<12x57xf32>
    %276 = vector.extract_strided_slice %241 {offsets = [0, 0], sizes = [12, 7], strides = [1, 1]} : vector<12x64xf32> to vector<12x7xf32>
    %277 = tpu.concatenate %275, %276 in 1 : vector<12x57xf32>, vector<12x7xf32> -> vector<12x64xf32>
    %c6_106 = arith.constant 6 : index
    %c0_107 = arith.constant 0 : index
    %278 = vector.load %arg4[%c6_106, %c0_107] : memref<9x64xf32, #tpu.memory_space<vmem>>, vector<1x64xf32>
    %279 = vector.broadcast %278 : vector<1x64xf32> to vector<12x64xf32>
    %280 = arith.mulf %277, %279 : vector<12x64xf32>
    %281 = vector.extract_strided_slice %241 {offsets = [0, 8], sizes = [12, 56], strides = [1, 1]} : vector<12x64xf32> to vector<12x56xf32>
    %282 = vector.extract_strided_slice %241 {offsets = [0, 0], sizes = [12, 8], strides = [1, 1]} : vector<12x64xf32> to vector<12x8xf32>
    %283 = tpu.concatenate %281, %282 in 1 : vector<12x56xf32>, vector<12x8xf32> -> vector<12x64xf32>
    %c7_108 = arith.constant 7 : index
    %c0_109 = arith.constant 0 : index
    %284 = vector.load %arg4[%c7_108, %c0_109] : memref<9x64xf32, #tpu.memory_space<vmem>>, vector<1x64xf32>
    %285 = vector.broadcast %284 : vector<1x64xf32> to vector<12x64xf32>
    %286 = arith.mulf %283, %285 : vector<12x64xf32>
    %287 = vector.extract_strided_slice %241 {offsets = [0, 9], sizes = [12, 55], strides = [1, 1]} : vector<12x64xf32> to vector<12x55xf32>
    %288 = vector.extract_strided_slice %241 {offsets = [0, 0], sizes = [12, 9], strides = [1, 1]} : vector<12x64xf32> to vector<12x9xf32>
    %289 = tpu.concatenate %287, %288 in 1 : vector<12x55xf32>, vector<12x9xf32> -> vector<12x64xf32>
    %c8_110 = arith.constant 8 : index
    %c0_111 = arith.constant 0 : index
    %290 = vector.load %arg4[%c8_110, %c0_111] : memref<9x64xf32, #tpu.memory_space<vmem>>, vector<1x64xf32>
    %291 = vector.broadcast %290 : vector<1x64xf32> to vector<12x64xf32>
    %292 = arith.mulf %289, %291 : vector<12x64xf32>
    %293 = tpu.concatenate %247, %253, %259, %265, %268, %274, %280, %286, %292 in 0 : vector<12x64xf32>, vector<12x64xf32>, vector<12x64xf32>, vector<12x64xf32>, vector<12x64xf32>, vector<12x64xf32>, vector<12x64xf32>, vector<12x64xf32>, vector<12x64xf32> -> vector<108x64xf32>
    %c0_112 = arith.constant 0 : index
    %c0_113 = arith.constant 0 : index
    %294 = vector.load %arg3[%c0_112, %c0_113] : memref<8x108xf32, #tpu.memory_space<vmem>>, vector<8x108xf32>
    %cst_114 = arith.constant dense<0.000000e+00> : vector<8x64xf32>
    %295 = tpu.matmul %294, %293, %cst_114 {dimension_numbers = #tpu.dot_dimension_numbers<[1], [0], [0], [1], [0, 0, 1, 1], [], []>} : vector<8x108xf32>, vector<108x64xf32>, vector<8x64xf32> -> vector<8x64xf32>
    %c0_115 = arith.constant 0 : index
    %c0_116 = arith.constant 0 : index
    %296 = vector.load %arg5[%c0_115, %c0_116] : memref<8x1xf32, #tpu.memory_space<vmem>>, vector<8x1xf32>
    %297 = vector.broadcast %296 : vector<8x1xf32> to vector<8x64xf32>
    %298 = arith.addf %295, %297 : vector<8x64xf32>
    %cst_117 = arith.constant 0.000000e+00 : f32
    %299 = vector.broadcast %cst_117 : f32 to vector<8x64xf32>
    %300 = arith.cmpf oge, %298, %299 : vector<8x64xf32>
    %cst_118 = arith.constant 1.000000e-01 : f32
    %301 = vector.broadcast %cst_118 : f32 to vector<8x64xf32>
    %302 = arith.mulf %301, %298 : vector<8x64xf32>
    %303 = arith.select %300, %298, %302 : vector<8x64xi1>, vector<8x64xf32>
    %c0_119 = arith.constant 0 : index
    %c0_120 = arith.constant 0 : index
    %c192 = arith.constant 192 : index
    %304 = vector.load %arg6[%c0_119, %c0_120, %c192] : memref<1x8x256xf32, #tpu.memory_space<vmem>>, vector<1x8x64xf32>
    %305 = vector.shape_cast %304 : vector<1x8x64xf32> to vector<8x64xf32>
    %306 = vector.shape_cast %303 : vector<8x64xf32> to vector<1x8x64xf32>
    tpu.vector_store %arg6[%c0_119, %c0_120, %c192], %306 {strides = array<i32>} : memref<1x8x256xf32, #tpu.memory_space<vmem>>, vector<1x8x64xf32>,
    return
  }
  func.func @transform_0(%arg0: i32, %arg1: i32) -> (i32, i32, i32, i32) {
    %c0_i32 = arith.constant 0 : i32
    %c0_i32_0 = arith.constant 0 : i32
    %c0_i32_1 = arith.constant 0 : i32
    %c0_i32_2 = arith.constant 0 : i32
    return %arg0, %c0_i32, %c0_i32_0, %c0_i32_1 : i32, i32, i32, i32
  }
  func.func @transform_1(%arg0: i32, %arg1: i32) -> (i32, i32) {
    %c0_i32 = arith.constant 0 : i32
    %c0_i32_0 = arith.constant 0 : i32
    %c0_i32_1 = arith.constant 0 : i32
    return %c0_i32, %c0_i32_0 : i32, i32
  }
  func.func @transform_2(%arg0: i32, %arg1: i32) -> (i32, i32) {
    %c0_i32 = arith.constant 0 : i32
    %c0_i32_0 = arith.constant 0 : i32
    %c0_i32_1 = arith.constant 0 : i32
    return %c0_i32, %c0_i32_0 : i32, i32
  }
  func.func @transform_3(%arg0: i32, %arg1: i32) -> (i32, i32) {
    %c0_i32 = arith.constant 0 : i32
    %c0_i32_0 = arith.constant 0 : i32
    %c0_i32_1 = arith.constant 0 : i32
    return %c0_i32, %c0_i32_0 : i32, i32
  }
  func.func @transform_4(%arg0: i32, %arg1: i32) -> (i32, i32, i32) {
    %c0_i32 = arith.constant 0 : i32
    %c0_i32_0 = arith.constant 0 : i32
    return %arg0, %c0_i32, %arg1 : i32, i32, i32
  }
}

</mosaic_0001>

<bundles_post_ra>
// kernel: tpu_custom_call.1
= control target key start
LH: loop header
LB: loop body
LE: loop exit
PB: predicated region body
PF: predicated region fallthrough
CT: control target
= control target key end

     0   :  { %s2731_s0 = inlined_call_operand.hbm [shape: f32[2,4,8,64], index: 0, kind: input, shape index: {}]   ;;  %s2732_s1 = inlined_call_operand.vmem [shape: f32[8,108], index: 1, kind: input, shape index: {}]   ;;  %s2733_s2 = inlined_call_operand.hbm [shape: f32[9,64], index: 2, kind: input, shape index: {}]   ;;  %s2734_s3 = inlined_call_operand.vmem [shape: f32[8,1], index: 3, kind: input, shape index: {}]   ;;  %s2735_s4 = inlined_call_operand.hbm [shape: f32[2,8,512], index: 4, kind: output, shape index: {}]  }
   0x1   :  { %2752 = sst [smem:[#allocation18_spill]] %s2733_s2 }
   0x2   :  { %2753 = sst [smem:[#allocation19_spill]] %s2735_s4 }
   0x3   :  { %9 = vsyncpa [#allocation3], 0 }
   0x4   :  { %11 = vsyncpa [#allocation3 + $0x1], 0 }
   0x5   :  { %12 = vsyncpa [#allocation6], 0 }
   0x6   :  { %13 = vsyncpa [#allocation4], 0 }
   0x7   :  { %15 = vsyncpa [#allocation4 + $0x1], 0  ;;  %s1881_s15 = smov 0   ;;  %s1883_s16 = smov 0  }
   0x8   :  { %s1885_s17 = smov 0   ;;  %s1887_s18 = smov 0  }
   0x9   :  { %s1889_s19 = smov 0   ;;  %s1891_s20 = smov 0  }
   0xa   :  { %s1893_s21 = smov 0   ;;  %s1895_s22 = smov 0  }
   0xb   :  { %s1897_s23 = smov 0   ;;  %s1899_s24 = smov 0  }
   0xc   :  { %s1901_s25 = smov 0  }
   0xd LB: > { %2754 = sst [smem:[#allocation11_spill]] %s1793_s15  ;;  %s1432_s26 = sadd.s32 4294967295, %s1833_s25   ;;  %s1833_s25 = sphi %s1901_s25, %s21_s25   ;;  %s1829_s24 = sphi %s1899_s24, %s2788_s24   ;;  %s1825_s23 = sphi %s1897_s23, %s2779_s23   ;;  %s1821_s22 = sphi %s1895_s22, %s2787_s22   ;;  %s1817_s21 = sphi %s1893_s21, %s2778_s21   ;;  %s1813_s20 = sphi %s1891_s20, %s2786_s20   ;;  %s1809_s19 = sphi %s1889_s19, %s2785_s19   ;;  %s1805_s18 = sphi %s1887_s18, %s2784_s18   ;;  %s1801_s17 = sphi %s1885_s17, %s2783_s17   ;;  %s1797_s16 = sphi %s1883_s16, %s2782_s16   ;;  %s1793_s15 = sphi %s1881_s15, %s2781_s15  }
   0xe   : > { %2755 = sst [smem:[#allocation12_spill]] %s1821_s22  ;;  %s1433_s27 = sadd.s32 4294967294, %s1833_s25  }
   0xf   : > { %2756 = sst [smem:[#allocation13_spill]] %s1825_s23  ;;  %p53_p0 = scmp.ne.s32.totalorder %s1809_s19, %s1805_s18 }
  0x10   : > { %p1937_p1 = scmp.eq.s32.totalorder %s1432_s26, 0  ;;  %p141_p2 = scmp.ne.s32.totalorder %s1801_s17, %s1797_s16 }
  0x11   : > { %p142_p3 = scmp.eq.s32.totalorder %s1432_s26, 3  ;;  %p147_p5 = scmp.ne.s32.totalorder %s1797_s16, %s1793_s15 }
  0x12   : > { %p1945_p4 = por %p1937_p1, %p53_p0  ;;  %p148_p7 = scmp.eq.s32.totalorder %s1433_s27, 3 }
  0x13   : > { %p1951_p6 = por %p142_p3, %p141_p2  ;;  %p1434_p8 = scmp.ge.s32.totalorder %s1833_s25, 1 }
  0x14   : > { %p155_p9 = scmp.lt.s32.totalorder %s1833_s25, 5  ;;  %p1957_p10 = por %p148_p7, %p147_p5 }
  0x15   : > { %s2759_s30 = scalar_select %p1951_p6, 1, 0 }
  0x16   : > { %s2761_s5 = scalar_select %p1957_p10, 1, 0 }
  0x17   : > { %2760 = sst [smem:[#allocation14_spill]] %s2759_s30  ;;  %p1961_p11 = pnand %p1434_p8, %p155_p9 }
  0x18   : > { %2762 = sst [smem:[#allocation15_spill]] %s2761_s5  ;;  %s1835_s10 = smov [#allocation5]  }
  0x19   : > { %s2764_s2 = sld [smem:[#allocation18_spill]]  ;;  %p1483_p12 = pneg %p1961_p11 }
  0x1a   : > { %s171_s11 = sshll.u32 %s1835_s10, 4  ;;  %s2736_s12 = smov 128   ;;  %s172_s11 = int_to_ptr.vmem [resolvable:$true] %s171_s11 }
  0x1b   : > { %p1484_p13 = pnand %p1483_p12, %p1937_p1  ;;  %s2737_s13 = smov 8  }
  0x1c   : > { %s30_s14 = sadd.s32 1, %s1825_s23  ;;  %s33_s18 = sadd.s32 1, %s1829_s24 }
  0x1d   : > { %p31_p0 = scmp.ge.s32.totalorder %s30_s14, 2  ;;  %s40_s26 = sadd.s32 1, %s1813_s20 }
  0x1e   : > { %p47_p2 = scmp.ne.s32.totalorder %s1813_s20, %s1809_s19  ;;  %p48_p3 = scmp.eq.s32.totalorder %s1833_s25, 0 }
  0x1f   : > { %s169_s9 = sshll.u32 %s2764_s2, 4  ;;  %s2790_s14 = smov (%p31_p0, %s30_s14), 0  ;;  %s170_s9 = int_to_ptr.hbm [resolvable:$true] %s169_s9 }
  0x20   : > { %1486 = dma.hbm_to_vmem [thread:$0]  (!%p1484_p13), %s170_s9, 256, %s172_s11, [#allocation6], %s2736_s12, %s2736_s12, %s2737_s13  }
  0x21   : > { %2765 = sst [smem:[#allocation16_spill]] %s2790_s14  ;;  %s2792_s18 = smov (!%p31_p0, %s33_s18), %s1829_s24 }
  0x22   : > { %p1984_p5 = por %p48_p3, %p47_p2  ;;  %s127_s7 = ssub.s32 %s1825_s23, %s2790_s14 }
  0x23   : > { %p35_p7 = scmp.ge.s32.totalorder %s2792_s18, 2  ;;  %s131_s8 = sadd.s32 1, %s1801_s17 }
  0x24   : > { %p1496_p8 = scmp.lt.s32.totalorder %s1833_s25, 4  ;;  %s188_s9 = sand.u32 1, %s1813_s20  }
  0x25   : > { %s2794_s18 = smov (%p35_p7, %s2792_s18), 0  ;;  %s1437_s10 = sshll.u32 %s188_s9, 5 }
  0x26   : > { %2767 = sst [smem:[#allocation17_spill]] %s2794_s18  ;;  %s37_s11 = ssub.s32 %s1829_s24, %s2794_s18 }
  0x27   : > { %p38_p9 = scmp.eq.s32.totalorder %s37_s11, 0  ;;  %s128_s12 = sor.u32 %s127_s7, %s37_s11 }
  0x28   : > { %p129_p12 = scmp.eq.s32.totalorder %s128_s12, 0  ;;  %s1474_s13 = sshll.u32 %s1829_s24, 5 }
  0x29   : > { %s1999_s2 = scalar_select %p38_p9, %s1813_s20, %s40_s26  }
  0x2a   : > { %s2002_s5 = scalar_select %p129_p12, %s1801_s17, %s131_s8  }
  0x2b   : > { %s197_s15 = scalar_lea.hbm %s2731_s0, %s1474_s13  ;;  %s192_s30 = scalar_lea.vmem [#allocation2], %s1437_s10 }
  0x2c   : > { %s200_s4 = sshll.u32 %s192_s30, 4  ;;  %s198_s22 = sshll.u32 %s197_s15, 4  ;;  %s201_s4 = int_to_ptr.vmem [resolvable:$true] %s200_s4  ;;  %s199_s22 = int_to_ptr.hbm [resolvable:$true] %s198_s22 }
  0x2d   : > { %p1488_p13 = pnand %p1496_p8, %p1984_p5  ;;  %s189_s18 = scalar_lea.sflag [#allocation3], %s188_s9 }
  0x2e   : > { %s2768_s7 = smov 8   ;;  %s2769_s12 = smov 128  }
  0x2f   : > { %1490 = dma.hbm_to_vmem [thread:$0]  (!%p1488_p13), %s199_s22, 512, %s201_s4, %s189_s18, %s2769_s12, %s2769_s12, %s2768_s7  }
  0x30   : > { %212 = sbr.rel (%p1961_p11) target bundleno = 678 (0x2a6), region = 36  ;;  %s214_s23 = sand.u32 (!%p1961_p11), 1, %s1809_s19  }
  0x31   : > { %s1441_s13 = sshll.u32 (!%p1961_p11), %s214_s23, 5  ;;  %s215_s14 = scalar_lea.sflag (!%p1961_p11), [#allocation3], %s214_s23 }
  0x32   : > { %s2017_s30 = scalar_lea.vmem (!%p1961_p11), [#allocation2], %s1441_s13 }
  0x35   : > { %1780 = dma.done.wait (%p1945_p4), %s215_s14, 512  }
  0x36   : > { %1782 = vsyncadd (%p1945_p4), %s215_s14, 4294966784 }
  0x37   : > { %1784 = dma.done.wait (%p1937_p1), [#allocation6], 256  }
  0x38   : > { %1786 = vsyncadd (%p1937_p1), [#allocation6], 4294967040  ;;  %s2028_s4 = sshll.u32 %s1817_s21, 2  ;;  %p259_p11 = scmp.gt.s32.totalorder %s1817_s21, 0  ;;  %vm311_vm0 = vcmask 1041409   ;;  %vm314_vm1 = vcmask 1042434  }
  0x39   : > { %s251_s15 = sadd.s32 4294967295, %s2028_s4  ;;  %s2033_s22 = scalar_lea.vmem %s2017_s30, %s2028_s4 [#allocation2]  ;;  %vm317_vm2 = vcmask 1043459   ;;  %vm326_vm3 = vcmask 1045509   ;;  %vm329_vm4 = vcmask 1046534   ;;  %vm332_vm5 = vcmask 1047559   ;;  %v2179_v58 = vld [vmem:[%s2734_s3] sm:$0xff] }
  0x3a   : > { %p252_p4 = scmp.gt.s32.totalorder %s251_s15, 0  ;;  %v2037_v0 = vld [vmem:[%s2033_s22 + $0x1] sm:$0x1]  ;;  %v2040_v1 = vld [vmem:[%s2033_s22 + $0x9] sm:$0x1]  ;;  %s1838_s18 = smov 72  }
  0x3b   : > { %v2043_v2 = vld [vmem:[%s2033_s22 + $0x11] sm:$0x1]  ;;  %v2046_v3 = vld [vmem:[%s2033_s22 + $0x19] sm:$0x1]  ;;  %v339_v4 = vrot.slane %v2040_v1, 7  ;;  %s1839_s26 = smov 9  }
  0x3c   : > { %s2796_s15 = smov (!%p252_p4, %s251_s15), 0  ;;  %v341_v5 = vrot.slane %v2043_v2, 6  ;;  %v2052_v6 = vld [vmem:[%s2033_s22] sm:$0x1]  ;;  %v343_v7 = vrot.slane %v2046_v3, 5  ;;  %s2750_s27 = smov 73  }
  0x3d   : > { %s254_s28 = scalar_lea.vmem %s2017_s30, %s2796_s15 [#allocation2]  ;;  %v340_v8 = vsel %vm311_vm0, %v339_v4, %v2037_v0  ;;  %v324_v12 = vrot.slane %v2052_v6, 4  ;;  %v2062_v14 = vld [vmem:[%s2033_s22 + $0x8] sm:$0x1]  ;;  %v2065_v15 = vld [vmem:[%s2033_s22 + $0x10] sm:$0x1]  ;;  %vm346_vm6 = vcmask 1043456  }
  0x3e   : > { %v255_v9 = vld [vmem:[%s254_s28] sm:$0x1]  ;;  %v256_v10 = vld [vmem:[%s254_s28 + $0x8] sm:$0x1]  ;;  %v257_v11 = vld [vmem:[%s254_s28 + $0x10] sm:$0x1]  ;;  %v342_v13 = vsel %vm314_vm1, %v341_v5, %v340_v8 }
  0x3f   : > { %s260_s29 = scalar_select %p259_p11, 1, 0  ;;  %v2068_v16 = vld [vmem:[%s2033_s22 + $0x18] sm:$0x1]  ;;  %v2071_v17 = vsel %vm317_vm2, %v343_v7, %v342_v13  ;;  %v325_v19 = vrot.slane %v2062_v14, 3  ;;  %v328_v20 = vrot.slane %v2065_v15, 2 }
  0x40   : > { %v258_v18 = vld [vmem:[%s254_s28 + $0x18] sm:$0x1]  ;;  %370 = vrot.lane.b32.xlu2 %v2071_v17, %s1838_s18  ;;  %357 = vrot.lane.b32.xlu1 %v2071_v17, %s1839_s26  ;;  %v331_v23 = vrot.slane %v2068_v16, 1  ;;  %s1841_s8 = smov 8   ;;  %s1842_s9 = smov 71   ;;  %v1847_v37 = vmov 0  }
  0x41   : > { %s261_s6 = scvt.s32.f32 %s260_s29  ;;  %351 = vrot.lane.b32.xlu0 %v2071_v17, %s2750_s27  ;;  %v327_v22 = vsel %vm326_vm3, %v325_v19, %v324_v12  ;;  %s1843_s10 = smov 7   ;;  %1608 = vset.pattern.permute.xlu2 %v1847_v37  ;;  %v576_v38 = vrot.slane %v2062_v14, 7  ;;  %v578_v39 = vrot.slane %v2065_v15, 6  ;;  %v580_v40 = vrot.slane %v2068_v16, 5  ;;  %v2159_v52 = vld [vmem:[%s2033_s22 + $0xa] sm:$0x1] }
  0x42   : > { %v330_v28 = vsel %vm329_vm4, %v328_v20, %v327_v22  ;;  %s1844_s11 = smov 65   ;;  %s1845_s7 = smov 1   ;;  %1609 = vset.pattern.permute.xlu0 %v1847_v37  ;;  %1610 = vset.pattern.permute.xlu1 %v1847_v37  ;;  %v583_v41 = vrot.slane %v2037_v0, 4  ;;  %v584_v42 = vrot.slane %v2040_v1, 3  ;;  %v586_v43 = vrot.slane %v2043_v2, 2 }
  0x43   : > { %v262_v21 = vstv %s261_s6  ;;  %v333_v33 = vsel %vm332_vm5, %v331_v23, %v330_v28  ;;  %s1846_s12 = smov 127   ;;  %s1848_s23 = smov 63   ;;  %v588_v44 = vrot.slane %v2046_v3, 1  ;;  %v577_v45 = vsel %vm311_vm0, %v576_v38, %v2052_v6  ;;  %v2166_v53 = vld [vmem:[%s2033_s22 + $0x12] sm:$0x1] }
  0x44   : > { %v263_v24 = vmul.f32 %v262_v21, %v255_v9  ;;  %v264_v25 = vmul.f32 %v262_v21, %v256_v10  ;;  %v265_v26 = vmul.f32 %v262_v21, %v257_v11  ;;  %v266_v27 = vmul.f32 %v262_v21, %v258_v18  ;;  %s1849_s13 = smov 121   ;;  %s2746_s14 = smov 57   ;;  %v2170_v55 = vld [vmem:[%s2033_s22 + $0x2] sm:$0x1]  ;;  %v2173_v56 = vld [vmem:[%s2033_s22 + $0x1a] sm:$0x1] }
  0x45   : > { %v579_v46 = vsel %vm314_vm1, %v578_v39, %v577_v45  ;;  %v585_v47 = vsel %vm326_vm3, %v584_v42, %v583_v41  ;;  %s2748_s15 = smov 120   ;;  %s1852_s28 = smov 56   ;;  %v595_v54 = vrot.slane %v2159_v52, 7  ;;  %v597_v57 = vrot.slane %v2166_v53, 6  ;;  %v1612_v15 = vld [vmem:[#allocation5 + $0x1] ss:$0 sm:$0xff] }
  0x46   : > { %v310_v29 = vrot.slane %v264_v25, 7  ;;  %v313_v30 = vrot.slane %v265_v26, 6  ;;  %v316_v31 = vrot.slane %v266_v27, 5  ;;  %v581_v48 = vsel %vm317_vm2, %v580_v40, %v579_v46  ;;  %s1853_s29 = smov 119   ;;  %p298_p1 = scmp.lt.s32.totalorder %s1817_s21, 1 }
  0x47   : > { %v587_v49 = vsel %vm329_vm4, %v586_v43, %v585_v47  ;;  %v596_v59 = vsel %vm311_vm0, %v595_v54, %v2170_v55  ;;  %v599_v60 = vrot.slane %v2173_v56, 5  ;;  %vm361_vm7 = vcmask 72704   ;;  %v2241_v23 = vld [vmem:[#allocation5] ss:$0 sm:$0xff]  ;;  %v2262_v41 = vld [vmem:[%s2033_s22 + $0x13] sm:$0x1] }
  0x48   : > { %v312_v32 = vsel %vm311_vm0, %v310_v29, %v263_v24  ;;  %376 = vrot.lane.b32.xlu1 %v2071_v17, %s1841_s8  ;;  %v589_v50 = vsel %vm332_vm5, %v588_v44, %v587_v49  ;;  %v598_v61 = vsel %vm314_vm1, %v597_v57, %v596_v59  ;;  %s299_s6 = scalar_select %p298_p1, 1, 0  ;;  %vm380_vm8 = vcmask 64512   ;;  %v2285_v54 = vld [vmem:[%s2033_s22 + $0x1b] sm:$0x1] }
  0x49   : > { %v315_v34 = vsel %vm314_vm1, %v313_v30, %v312_v32  ;;  %v2144_v51 = vsel %vm346_vm6, %v581_v48, %v589_v50  ;;  %v2191_v62 = vsel %vm317_vm2, %v599_v60, %v598_v61  ;;  %v2248_v32 = vld [vmem:[%s2033_s22 + $0x3] sm:$0x1]  ;;  %vm399_vm9 = vcmask 56320  }
  0x4a   : > { %v318_v35 = vsel %vm317_vm2, %v316_v31, %v315_v34  ;;  %v1064_v42 = vrot.slane %v2248_v32, 4  ;;  %v1067_v57 = vrot.slane %v2262_v41, 2  ;;  %v1069_v60 = vrot.slane %v2285_v54, 1 }
  0x4b   : > { %v2091_v36 = vsel %vm346_vm6, %v318_v35, %v333_v33  ;;  %v2251_v33 = vld [vmem:[%s2033_s22 + $0xb] sm:$0x1]  ;;  %s2771_s22 = smov 57   ;;  %vm479_vm10 = vcmask 457728   ;;  %vm498_vm11 = vcmask 449536   ;;  %vm441_vm12 = vcmask 515072  }
  0x4c   : > { %368 = vrot.lane.b32.xlu2 %v2091_v36, %s1838_s18  ;;  %349 = vrot.lane.b32.xlu0 %v2091_v36, %s2750_s27  ;;  %v1065_v43 = vrot.slane %v2251_v33, 3  ;;  %vm460_vm13 = vcmask 465920   ;;  %vm418_vm14 = vcmask 7168   ;;  %vm544_vm15 = vcmask 883712  }
  0x4e   : > { %v1066_v59 = vsel %vm326_vm3, %v1065_v43, %v1064_v42  ;;  %v1616_v43 = vld [vmem:[#allocation5 + $0x6] ss:$0 sm:$0xff] }
  0x4f   : > { %v1068_v61 = vsel %vm329_vm4, %v1067_v57, %v1066_v59 }
  0x50   : > { %355 = vrot.lane.b32.xlu1 %v2091_v36, %s1839_s26 }
  0x54   : > { %387 = vrot.lane.b32.xlu2 %v2091_v36, %s1842_s9  ;;  %374 = vrot.lane.b32.xlu0 %v2091_v36, %s1841_s8 }
  0x58   : > { %393 = vrot.lane.b32.xlu1 %v2091_v36, %s1843_s10 }
  0x5c   : > { %395 = vrot.lane.b32.xlu2 %v2071_v17, %s1843_s10  ;;  %389 = vrot.lane.b32.xlu0 %v2071_v17, %s1842_s9 }
  0x60   : > { %408 = vrot.lane.b32.xlu1 %v2071_v17, %s1844_s11 }
  0x64   : > { %412 = vrot.lane.b32.xlu2 %v2091_v36, %s1845_s7  ;;  %406 = vrot.lane.b32.xlu0 %v2091_v36, %s1844_s11 }
  0x68   : > { %429 = vrot.lane.b32.xlu1 %v2091_v36, %s1846_s12 }
  0x6c   : > { %431 = vrot.lane.b32.xlu2 %v2071_v17, %s1846_s12  ;;  %414 = vrot.lane.b32.xlu0 %v2071_v17, %s1845_s7 }
  0x70   : > { %437 = vrot.lane.b32.xlu1 %v2071_v17, %s1848_s23 }
  0x74   : > { %448 = vrot.lane.b32.xlu2 %v2091_v36, %s1849_s13  ;;  %435 = vrot.lane.b32.xlu0 %v2091_v36, %s1848_s23 }
  0x78   : > { %454 = vrot.lane.b32.xlu1 %v2091_v36, %s2746_s14 }
  0x7c   : > { %456 = vrot.lane.b32.xlu2 %v2071_v17, %s2746_s14  ;;  %450 = vrot.lane.b32.xlu0 %v2071_v17, %s1849_s13  ;;  %s290_s14 = sadd.s32 4, %s2028_s4  ;;  %s300_s4 = scvt.s32.f32 %s299_s6 }
  0x7d   : > { %p291_p0 = scmp.lt.s32.totalorder %s290_s14, 7  ;;  %s2772_s6 = smov 73  }
  0x7e   : > { %v301_v9 = vstv %s300_s4  ;;  %s2774_s4 = sld [smem:[#allocation19_spill]] }
  0x7f   : > { %s2798_s14 = smov (!%p291_p0, %s290_s14), 7 }
  0x80   : > { %469 = vrot.lane.b32.xlu1 %v2071_v17, %s2748_s15 }
  0x84   : > { %473 = vrot.lane.b32.xlu2 %v2091_v36, %s1852_s28  ;;  %467 = vrot.lane.b32.xlu0 %v2091_v36, %s2748_s15  ;;  %s1854_s15 = smov 55  }
  0x88   : > { %486 = vrot.lane.b32.xlu1 %v2091_v36, %s1853_s29 }
  0x8c   : > { %488 = vrot.lane.b32.xlu2 %v2071_v17, %s1853_s29  ;;  %475 = vrot.lane.b32.xlu0 %v2071_v17, %s1852_s28 }
  0x90   : > { %494 = vrot.lane.b32.xlu1 %v2071_v17, %s1854_s15 }
  0x94   : > { %541 = vperm.xlu2 %1608, %v2179_v58   ;;  %492 = vrot.lane.b32.xlu0 %v2091_v36, %s1854_s15 }
  0x98   : > { %606 = vrot.lane.b32.xlu1 %v2191_v62, %s2750_s27 }
  0x9a   : > { %v371_v63 = vpop.permute.xlu2 %370 }
  0x9c   : > { %610 = vrot.lane.b32.xlu2 %v2144_v51, %s1839_s26  ;;  %604 = vrot.lane.b32.xlu0 %v2144_v51, %s2750_s27  ;;  %s293_s27 = scalar_lea.vmem %s2017_s30, %s2798_s14 [#allocation2]  ;;  %s2770_s30 = smov 120  }
  0x9d   : > { %v295_v8 = vld [vmem:[%s293_s27 + $0x8] sm:$0x1]  ;;  %v296_v12 = vld [vmem:[%s293_s27 + $0x10] sm:$0x1]  ;;  %v294_v14 = vld [vmem:[%s293_s27] sm:$0x1] }
  0x9e   : > { %v303_v13 = vmul.f32 %v301_v9, %v295_v8  ;;  %v304_v16 = vmul.f32 %v301_v9, %v296_v12  ;;  %v297_v19 = vld [vmem:[%s293_s27 + $0x18] sm:$0x1]  ;;  %v302_v20 = vmul.f32 %v301_v9, %v294_v14 }
  0x9f   : > { %v305_v28 = vmul.f32 %v301_v9, %v297_v19 }
  0xa0   : > { %622 = vrot.lane.b32.xlu1 %v2144_v51, %s1838_s18  ;;  %v1076_v21 = vrot.slane %v303_v13, 7  ;;  %v1078_v29 = vrot.slane %v304_v16, 6 }
  0xa1   : > { %v1080_v39 = vrot.slane %v305_v28, 5 }
  0xa2   : > { %v1077_v31 = vsel %vm311_vm0, %v1076_v21, %v302_v20 }
  0xa3   : > { %v1079_v38 = vsel %vm314_vm1, %v1078_v29, %v1077_v31  ;;  %v1615_v31 = vld [vmem:[#allocation5 + $0x5] ss:$0 sm:$0xff] }
  0xa4   : > { %624 = vrot.lane.b32.xlu2 %v2191_v62, %s1838_s18  ;;  %612 = vrot.lane.b32.xlu0 %v2191_v62, %s1839_s26  ;;  %v2282_v50 = vsel %vm317_vm2, %v1080_v39, %v1079_v38 }
  0xa6   : > { %v369_v0 = vpop.permute.xlu2 %368 }
  0xa8   : > { %630 = vrot.lane.b32.xlu1 %v2191_v62, %s1841_s8 }
  0xac   : > { %640 = vrot.lane.b32.xlu2 %v2144_v51, %s1842_s9  ;;  %628 = vrot.lane.b32.xlu0 %v2144_v51, %s1841_s8 }
  0xae   : > { %v2211_v1 = vpop.permute.xlu2 %387 }
  0xb0   : > { %646 = vrot.lane.b32.xlu1 %v2144_v51, %s1843_s10 }
  0xb2   : > { %v358_v2 = vpop.permute.xlu1 %357 }
  0xb3   : > { %v352_v3 = vpop.permute.xlu0 %351 }
  0xb4   : > { %648 = vrot.lane.b32.xlu2 %v2191_v62, %s1843_s10  ;;  %642 = vrot.lane.b32.xlu0 %v2191_v62, %s1842_s9  ;;  %v363_v4 = vsel %vm361_vm7, %v352_v3, %v358_v2  ;;  %v1070_v2 = vsel %vm332_vm5, %v1069_v60, %v1068_v61 }
  0xb5   : > { %v367_v34 = vmul.f32 %v2241_v23, %v363_v4  ;;  %v2304_v3 = vsel %vm346_vm6, %v2191_v62, %v1070_v2 }
  0xb6   : > { %v396_v5 = vpop.permute.xlu2 %395 }
  0xb8   : > { %660 = vrot.lane.b32.xlu1 %v2191_v62, %s1844_s11 }
  0xba   : > { %v377_v6 = vpop.permute.xlu1 %376 }
  0xbb   : > { %v382_v7 = vsel %vm380_vm8, %v371_v63, %v377_v6 }
  0xbc   : > { %664 = vrot.lane.b32.xlu2 %v2144_v51, %s1845_s7  ;;  %658 = vrot.lane.b32.xlu0 %v2144_v51, %s1844_s11  ;;  %v386_v24 = vmul.f32 %v1612_v15, %v382_v7 }
  0xbe   : > { %v2230_v10 = vpop.permute.xlu2 %412  ;;  %v350_v11 = vpop.permute.xlu0 %349  ;;  %v508_v35 = vrot.slane %v386_v24, 4  ;;  %v1617_v24 = vld [vmem:[#allocation5 + $0x7] ss:$0 sm:$0xff] }
  0xc0   : > { %680 = vrot.lane.b32.xlu1 %v2144_v51, %s1846_s12 }
  0xc2   : > { %v356_v18 = vpop.permute.xlu1 %355 }
  0xc3   : > { %v2239_v22 = vsel %vm361_vm7, %v350_v11, %v356_v18 }
  0xc4   : > { %682 = vrot.lane.b32.xlu2 %v2191_v62, %s1846_s12  ;;  %666 = vrot.lane.b32.xlu0 %v2191_v62, %s1845_s7 }
  0xc6   : > { %v2243_v25 = vpop.permute.xlu2 %431  ;;  %v375_v26 = vpop.permute.xlu0 %374 }
  0xc7   : > { %v381_v27 = vsel %vm380_vm8, %v369_v0, %v375_v26  ;;  %v1618_v26 = vld [vmem:[#allocation5 + $0x8] ss:$0 sm:$0xff] }
  0xc8   : > { %v385_v30 = vmul.f32 %v1612_v15, %v381_v27  ;;  %688 = vrot.lane.b32.xlu1 %v2191_v62, %s1848_s23 }
  0xca   : > { %v507_v37 = vrot.slane %v385_v30, 4  ;;  %v394_v40 = vpop.permute.xlu1 %393 }
  0xcb   : > { %v2274_v46 = vsel %vm399_vm9, %v2211_v1, %v394_v40 }
  0xcc   : > { %698 = vrot.lane.b32.xlu2 %v2144_v51, %s1849_s13  ;;  %686 = vrot.lane.b32.xlu0 %v2144_v51, %s1848_s23  ;;  %v2267_v44 = vsel %vm346_vm6, %v507_v37, %v508_v35  ;;  %v2270_v45 = vsel %vm346_vm6, %v367_v34, %v507_v37 }
  0xce   : > { %v2276_v47 = vpop.permute.xlu2 %448  ;;  %v390_v48 = vpop.permute.xlu0 %389 }
  0xcf   : > { %v2279_v49 = vsel %vm399_vm9, %v390_v48, %v396_v5 }
  0xd0   : > { %1217 = vrot.lane.b32.xlu1 %v2282_v50, %s1853_s29 }
  0xd2   : > { %v2297_v63 = vpop.permute.xlu1 %408 }
  0xd4   : > { %1223 = vrot.lane.b32.xlu2 %v2282_v50, %s1854_s15  ;;  %700 = vrot.lane.b32.xlu0 %v2191_v62, %s1849_s13 }
  0xd6   : > { %v457_v0 = vpop.permute.xlu2 %456  ;;  %v2299_v1 = vpop.permute.xlu0 %406 }
  0xd8   : > { %1199 = vrot.lane.b32.xlu1 %v2282_v50, %s2770_s30 }
  0xda   : > { %v430_v4 = vpop.permute.xlu1 %429 }
  0xdc   : > { %1203 = vrot.lane.b32.xlu2 %v2304_v3, %s1852_s28  ;;  %1197 = vrot.lane.b32.xlu0 %v2304_v3, %s2770_s30 }
  0xde   : > { %v474_v5 = vpop.permute.xlu2 %473  ;;  %v2312_v6 = vpop.permute.xlu0 %414 }
  0xe0   : > { %1215 = vrot.lane.b32.xlu1 %v2304_v3, %s1853_s29 }
  0xe2   : > { %v438_v7 = vpop.permute.xlu1 %437 }
  0xe3   : > { %v443_v39 = vsel %vm441_vm12, %v2243_v25, %v438_v7  ;;  %v1619_v7 = vld [vmem:[#allocation5 + $0x4] ss:$0 sm:$0xff] }
  0xe4   : > { %1221 = vrot.lane.b32.xlu2 %v2304_v3, %s1854_s15  ;;  %1205 = vrot.lane.b32.xlu0 %v2282_v50, %s1852_s28  ;;  %v447_v60 = vmul.f32 %v1615_v31, %v443_v39  ;;  %v1621_v39 = vld [vmem:[#allocation5 + $0x1] ss:$0 sm:$0xff] }
  0xe6   : > { %v489_v8 = vpop.permute.xlu2 %488  ;;  %v436_v9 = vpop.permute.xlu0 %435 }
  0xe7   : > { %v442_v40 = vsel %vm441_vm12, %v430_v4, %v436_v9  ;;  %v1614_v9 = vld [vmem:[#allocation5 + $0x3] ss:$0 sm:$0xff] }
  0xe8   : > { %1187 = vrot.lane.b32.xlu1 %v2282_v50, %s2771_s22  ;;  %v446_v61 = vmul.f32 %v1615_v31, %v442_v40 }
  0xea   : > { %v455_v11 = vpop.permute.xlu1 %454 }
  0xeb   : > { %v461_v25 = vsel %vm460_vm13, %v2276_v47, %v455_v11 }
  0xec   : > { %736 = vrot.lane.b32.xlu2 %v2191_v62, %s1853_s29  ;;  %1181 = vrot.lane.b32.xlu0 %v2282_v50, %s1849_s13 }
  0xee   : > { %v2326_v12 = vpop.permute.xlu2 %541  ;;  %v451_v13 = vpop.permute.xlu0 %450 }
  0xef   : > { %v462_v59 = vsel %vm460_vm13, %v451_v13, %v457_v0  ;;  %v522_v13 = vrot.slane %v447_v60, 4  ;;  %v2405_v60 = vld [vmem:[#allocation5] ss:$0 sm:$0xff] }
  0xf0   : > { %716 = vrot.lane.b32.xlu1 %v2144_v51, %s2770_s30  ;;  %v466_v4 = vmul.f32 %v1616_v43, %v462_v59 }
  0xf2   : > { %v470_v14 = vpop.permute.xlu1 %469 }
  0xf4   : > { %718 = vrot.lane.b32.xlu2 %v2191_v62, %s2770_s30  ;;  %742 = vrot.lane.b32.xlu0 %v2191_v62, %s1854_s15 }
  0xf6   : > { %v611_v15 = vpop.permute.xlu2 %610  ;;  %v468_v16 = vpop.permute.xlu0 %467 }
  0xf7   : > { %v480_v27 = vsel %vm479_vm10, %v468_v16, %v474_v5 }
  0xf8   : > { %724 = vrot.lane.b32.xlu1 %v2191_v62, %s1852_s28  ;;  %v484_v34 = vmul.f32 %v1617_v24, %v480_v27  ;;  %v427_v27 = vmul.f32 %v1619_v7, %v2091_v36 }
  0xfa   : > { %v487_v18 = vpop.permute.xlu1 %486  ;;  %v528_v2 = vrot.slane %v484_v34, 4 }
  0xfc   : > { %1161 = vrot.lane.b32.xlu2 %v2304_v3, %s1846_s12  ;;  %722 = vrot.lane.b32.xlu0 %v2144_v51, %s1852_s28  ;;  %v536_v16 = vsel %vm346_vm6, %v466_v4, %v528_v2  ;;  %v2416_v4 = vld [vmem:[%s2732_s1] sm:$0xff] }
  0xfe   : > { %v2340_v19 = vpop.permute.xlu2 %624  ;;  %v476_v20 = vpop.permute.xlu0 %475 }
  0xff   : > { %v481_v21 = vsel %vm479_vm10, %v470_v14, %v476_v20  ;;  %v521_v14 = vrot.slane %v446_v61, 4 }
 0x100   : > { %1167 = vrot.lane.b32.xlu1 %v2304_v3, %s1848_s23  ;;  %v485_v28 = vmul.f32 %v1617_v24, %v481_v21  ;;  %v465_v21 = vmul.f32 %v1616_v43, %v461_v25 }
 0x102   : > { %v495_v29 = vpop.permute.xlu1 %494  ;;  %v529_v48 = vrot.slane %v485_v28, 4  ;;  %v1613_v28 = vld [vmem:[#allocation5 + $0x2] ss:$0 sm:$0xff] }
 0x103   : > { %v500_v30 = vsel %vm498_vm11, %v489_v8, %v495_v29  ;;  %v420_v8 = vsel %vm418_vm14, %v2297_v63, %v2312_v6  ;;  %v428_v63 = vmul.f32 %v1619_v7, %v2071_v17  ;;  %v405_v36 = vmul.f32 %v1613_v28, %v2279_v49 }
 0x104   : > { %1169 = vrot.lane.b32.xlu2 %v2282_v50, %s1848_s23  ;;  %1163 = vrot.lane.b32.xlu0 %v2282_v50, %s1846_s12  ;;  %v504_v38 = vmul.f32 %v1618_v26, %v500_v30  ;;  %v530_v0 = vsel %vm346_vm6, %v528_v2, %v529_v48  ;;  %v424_v24 = vmul.f32 %v1614_v9, %v420_v8 }
 0x105   : > { %v404_v40 = vmul.f32 %v1613_v28, %v2274_v46  ;;  %v366_v2 = vmul.f32 %v2241_v23, %v2239_v22 }
 0x106   : > { %v2351_v35 = vpop.permute.xlu2 %640  ;;  %v493_v37 = vpop.permute.xlu0 %492  ;;  %1460 = vmatpush.msk.msra.mxu0 %vm346_vm6, %v504_v38 }
 0x107   : > { %v499_v42 = vsel %vm498_vm11, %v487_v18, %v493_v37  ;;  %v419_v18 = vsel %vm418_vm14, %v2299_v1, %v2230_v10  ;;  %v515_v10 = vrot.slane %v424_v24, 4 }
 0x108   : > { %v503_v57 = vmul.f32 %v1618_v26, %v499_v42  ;;  %740 = vrot.lane.b32.xlu1 %v2144_v51, %s1854_s15  ;;  %v423_v6 = vmul.f32 %v1614_v9, %v419_v18  ;;  %v523_v26 = vsel %vm346_vm6, %v521_v14, %v522_v13  ;;  %v1623_v9 = vld [vmem:[#allocation5 + $0x3] ss:$0 sm:$0xff]  ;;  %v2444_v13 = vld [vmem:[#allocation5 + $0x2] ss:$0 sm:$0xff] }
 0x10a   : > { %554 = vmatpush.msra.mxu0 %v503_v57  ;;  %v607_v5 = vpop.permute.xlu1 %606  ;;  %v514_v29 = vrot.slane %v423_v6, 4 }
 0x10c   : > { %1179 = vrot.lane.b32.xlu2 %v2304_v3, %s1849_s13  ;;  %734 = vrot.lane.b32.xlu0 %v2144_v51, %s1853_s29  ;;  %v516_v37 = vsel %vm346_vm6, %v514_v29, %v515_v10  ;;  %v534_v38 = vsel %vm346_vm6, %v405_v36, %v514_v29  ;;  %v840_v10 = vrot.slane %v2262_v41, 6  ;;  %v1624_v29 = vld [vmem:[#allocation5 + $0x5] ss:$0 sm:$0xff]  ;;  %v826_v41 = vrot.slane %v2170_v55, 4 }
 0x10d   : > { %555 = vmatpush.msra.mxu0 %v530_v0 }
 0x10e   : > { %v2371_v47 = vpop.permute.xlu2 %648  ;;  %v605_v11 = vpop.permute.xlu0 %604 }
 0x10f   : > { %v2378_v20 = vsel %vm361_vm7, %v605_v11, %v611_v15  ;;  %556 = vmatpush.msra.mxu0 %v536_v16  ;;  %v535_v15 = vsel %vm346_vm6, %v428_v63, %v521_v14  ;;  %v838_v63 = vrot.slane %v2251_v33, 7 }
 0x110   : > { %706 = vrot.lane.b32.xlu1 %v2191_v62, %s2771_s22 }
 0x111   : > { %557 = vmatpush.msra.mxu0 %v465_v21 }
 0x112   : > { %v623_v1 = vpop.permute.xlu1 %622 }
 0x113   : > { %558 = vmatpush.msra.mxu0 %v523_v26 }
 0x114   : > { %1139 = vrot.lane.b32.xlu2 %v2304_v3, %s1844_s11  ;;  %1185 = vrot.lane.b32.xlu0 %v2304_v3, %s2771_s22 }
 0x115   : > { %559 = vmatpush.msra.mxu0 %v535_v15 }
 0x116   : > { %v665_v30 = vpop.permute.xlu2 %664  ;;  %v613_v31 = vpop.permute.xlu0 %612 }
 0x117   : > { %v617_v34 = vsel %vm361_vm7, %v607_v5, %v613_v31  ;;  %560 = vmatpush.msra.mxu0 %v427_v27 }
 0x118   : > { %1145 = vrot.lane.b32.xlu1 %v2304_v3, %s1845_s7  ;;  %v621_v25 = vmul.f32 %v2405_v60, %v617_v34 }
 0x119   : > { %561 = vmatpush.msra.mxu0 %v516_v37 }
 0x11a   : > { %v631_v42 = vpop.permute.xlu1 %630 }
 0x11b   : > { %562 = vmatpush.msra.mxu0 %v534_v38  ;;  %v635_v49 = vsel %vm380_vm8, %v2340_v19, %v631_v42  ;;  %v829_v42 = vrot.slane %v2166_v53, 2 }
 0x11c   : > { %1147 = vrot.lane.b32.xlu2 %v2282_v50, %s1845_s7  ;;  %1141 = vrot.lane.b32.xlu0 %v2282_v50, %s1844_s11  ;;  %v639_v48 = vmul.f32 %v1621_v39, %v635_v49 }
 0x11d   : > { %563 = vmatpush.msra.mxu0 %v404_v40 }
 0x11e   : > { %v683_v43 = vpop.permute.xlu2 %682  ;;  %v629_v57 = vpop.permute.xlu0 %628  ;;  %v755_v46 = vrot.slane %v639_v48, 4 }
 0x11f   : > { %v634_v59 = vsel %vm380_vm8, %v623_v1, %v629_v57  ;;  %564 = vmatpush.msra.mxu0 %v2267_v44  ;;  %v839_v1 = vsel %vm311_vm0, %v838_v63, %v2248_v32  ;;  %v827_v32 = vrot.slane %v2159_v52, 3  ;;  %v1626_v57 = vld [vmem:[#allocation5 + $0x8] ss:$0 sm:$0xff] }
 0x120   : > { %v638_v61 = vmul.f32 %v1621_v39, %v634_v59  ;;  %1123 = vrot.lane.b32.xlu1 %v2282_v50, %s1842_s9  ;;  %v841_v31 = vsel %vm314_vm1, %v840_v10, %v839_v1  ;;  %v2529_v10 = vld [vmem:[#allocation5 + $0x6] ss:$0 sm:$0xff]  ;;  %vm574_vm1 = vcmask 523264  }
 0x121   : > { %565 = vmatpush.msra.mxu0 %v2270_v45  ;;  %v828_v52 = vsel %vm326_vm3, %v827_v32, %v826_v41  ;;  %v1628_v41 = vld [vmem:[#allocation5 + $0x8] ss:$0 sm:$0xff] }
 0x122   : > { %v754_v19 = vrot.slane %v638_v61, 4  ;;  %v647_v22 = vpop.permute.xlu1 %646  ;;  %v830_v59 = vsel %vm329_vm4, %v829_v42, %v828_v52 }
 0x123   : > { %566 = vmatpush.msra.mxu0 %v366_v2  ;;  %v2432_v45 = vsel %vm399_vm9, %v2351_v35, %v647_v22 }
 0x124   : > { %1129 = vrot.lane.b32.xlu2 %v2282_v50, %s1843_s10  ;;  %704 = vrot.lane.b32.xlu0 %v2144_v51, %s2771_s22  ;;  %v2423_v23 = vsel %vm346_vm6, %v754_v19, %v755_v46  ;;  %v2426_v44 = vsel %vm346_vm6, %v621_v25, %v754_v19 }
 0x125   : > { %1461 = vmatmul.msk.f32.vlgmr.msra.gmra.mxu0 %vm544_vm15, %v2416_v4 }
 0x126   : > { %v2434_v5 = vpop.permute.xlu2 %698  ;;  %v643_v0 = vpop.permute.xlu0 %642 }
 0x127   : > { %v653_v7 = vsel %vm399_vm9, %v643_v0, %v2371_v47 }
 0x128   : > { %1105 = vrot.lane.b32.xlu1 %v2282_v50, %s1838_s18  ;;  %v657_v47 = vmul.f32 %v2444_v13, %v653_v7 }
 0x12a   : > { %v661_v8 = vpop.permute.xlu1 %660 }
 0x12c   : > { %1109 = vrot.lane.b32.xlu2 %v2304_v3, %s1841_s8  ;;  %1103 = vrot.lane.b32.xlu0 %v2304_v3, %s1838_s18 }
 0x12e   : > { %v1224_v35 = vpop.permute.xlu2 %1223  ;;  %v659_v14 = vpop.permute.xlu0 %658 }
 0x12f   : > { %v670_v11 = vsel %vm418_vm14, %v659_v14, %v665_v30  ;;  %v842_v30 = vrot.slane %v2285_v54, 5 }
 0x130   : > { %v674_v16 = vmul.f32 %v1623_v9, %v670_v11  ;;  %1121 = vrot.lane.b32.xlu1 %v2304_v3, %s1842_s9 }
 0x131   : > { %v2478_v40 = vsel %vm317_vm2, %v842_v30, %v841_v31 }
 0x132   : > { %v761_v18 = vrot.slane %v674_v16, 4  ;;  %v681_v21 = vpop.permute.xlu1 %680 }
 0x134   : > { %1127 = vrot.lane.b32.xlu2 %v2304_v3, %s1843_s10  ;;  %1111 = vrot.lane.b32.xlu0 %v2282_v50, %s1841_s8  ;;  %v2455_v24 = vsel %vm346_vm6, %v657_v47, %v761_v18 }
 0x136   : > { %v1204_v6 = vpop.permute.xlu2 %1203  ;;  %v667_v26 = vpop.permute.xlu0 %666 }
 0x137   : > { %v671_v27 = vsel %vm418_vm14, %v661_v8, %v667_v26 }
 0x138   : > { %v675_v28 = vmul.f32 %v1623_v9, %v671_v27  ;;  %1093 = vrot.lane.b32.xlu1 %v2282_v50, %s1839_s26  ;;  %v1625_v9 = vld [vmem:[#allocation5 + $0x7] ss:$0 sm:$0xff] }
 0x13a   : > { %v762_v15 = vrot.slane %v675_v28, 4  ;;  %v689_v33 = vpop.permute.xlu1 %688 }
 0x13b   : > { %v693_v36 = vsel %vm441_vm12, %v683_v43, %v689_v33  ;;  %v831_v43 = vrot.slane %v2173_v56, 1 }
 0x13c   : > { %1085 = vrot.lane.b32.xlu2 %v2304_v3, %s2772_s6  ;;  %1087 = vrot.lane.b32.xlu0 %v2282_v50, %s2772_s6  ;;  %v2473_v34 = vsel %vm346_vm6, %v761_v18, %v762_v15  ;;  %v697_v54 = vmul.f32 %v1624_v29, %v693_v36 }
 0x13d   : > { %v832_v56 = vsel %vm332_vm5, %v831_v43, %v830_v59  ;;  %vm824_vm5 = vcmask 1048064  }
 0x13e   : > { %v1222_v37 = vpop.permute.xlu2 %1221  ;;  %v687_v38 = vpop.permute.xlu0 %686  ;;  %v769_v49 = vrot.slane %v697_v54, 4  ;;  %v2505_v22 = vsel %vm346_vm6, %v2071_v17, %v832_v56 }
 0x13f   : > { %v692_v39 = vsel %vm441_vm12, %v681_v21, %v687_v38 }
 0x140   : > { %v2481_v48 = vmul.f32 %v1624_v29, %v692_v39  ;;  %979 = vrot.lane.b32.xlu1 %v2478_v40, %s1853_s29 }
 0x142   : > { %v768_v55 = vrot.slane %v2481_v48, 4  ;;  %v1218_v53 = vpop.permute.xlu1 %1217 }
 0x143   : > { %v1228_v61 = vsel %vm498_vm11, %v1218_v53, %v1224_v35 }
 0x144   : > { %985 = vrot.lane.b32.xlu2 %v2478_v40, %s1854_s15  ;;  %1091 = vrot.lane.b32.xlu0 %v2304_v3, %s1839_s26  ;;  %v2496_v46 = vsel %vm346_vm6, %v768_v55, %v769_v49  ;;  %v1232_v19 = vmul.f32 %v1626_v57, %v1228_v61 }
 0x146   : > { %v737_v2 = vpop.permute.xlu2 %736  ;;  %v2499_v25 = vpop.permute.xlu0 %700  ;;  %1466 = vmatpush.msk.msra.mxu3 %vm346_vm6, %v1232_v19 }
 0x148   : > { %961 = vrot.lane.b32.xlu1 %v2478_v40, %s2770_s30 }
 0x14a   : > { %v1200_v0 = vpop.permute.xlu1 %1199 }
 0x14c   : > { %965 = vrot.lane.b32.xlu2 %v2505_v22, %s1852_s28  ;;  %959 = vrot.lane.b32.xlu0 %v2505_v22, %s2770_s30 }
 0x14e   : > { %v719_v7 = vpop.permute.xlu2 %718  ;;  %v1198_v8 = vpop.permute.xlu0 %1197 }
 0x14f   : > { %v1209_v35 = vsel %vm479_vm10, %v1198_v8, %v1204_v6 }
 0x150   : > { %977 = vrot.lane.b32.xlu1 %v2505_v22, %s1853_s29  ;;  %v1213_v11 = vmul.f32 %v1625_v9, %v1209_v35  ;;  %v1630_v35 = vld [vmem:[#allocation5 + $0x5] ss:$0 sm:$0xff] }
 0x152   : > { %v1216_v17 = vpop.permute.xlu1 %1215  ;;  %v1256_v26 = vrot.slane %v1213_v11, 4 }
 0x153   : > { %v1227_v14 = vsel %vm498_vm11, %v1216_v17, %v1222_v37 }
 0x154   : > { %983 = vrot.lane.b32.xlu2 %v2505_v22, %s1854_s15  ;;  %967 = vrot.lane.b32.xlu0 %v2478_v40, %s1852_s28  ;;  %v1231_v18 = vmul.f32 %v1626_v57, %v1227_v14  ;;  %v1629_v57 = vld [vmem:[#allocation5 + $0x7] ss:$0 sm:$0xff] }
 0x156   : > { %v1162_v16 = vpop.permute.xlu2 %1161  ;;  %v1206_v47 = vpop.permute.xlu0 %1205  ;;  %1281 = vmatpush.msra.mxu3 %v1231_v18 }
 0x157   : > { %v1210_v21 = vsel %vm479_vm10, %v1200_v0, %v1206_v47  ;;  %v1631_v47 = vld [vmem:[#allocation5 + $0x6] ss:$0 sm:$0xff] }
 0x158   : > { %v1214_v63 = vmul.f32 %v1625_v9, %v1210_v21  ;;  %949 = vrot.lane.b32.xlu1 %v2478_v40, %s2771_s22 }
 0x15a   : > { %v1257_v27 = vrot.slane %v1214_v63, 4  ;;  %v1188_v28 = vpop.permute.xlu1 %1187 }
 0x15c   : > { %923 = vrot.lane.b32.xlu2 %v2505_v22, %s1846_s12  ;;  %943 = vrot.lane.b32.xlu0 %v2478_v40, %s1849_s13  ;;  %v1258_v6 = vsel %vm346_vm6, %v1256_v26, %v1257_v27 }
 0x15d   : > { %1282 = vmatpush.msra.mxu3 %v1258_v6 }
 0x15e   : > { %v1170_v1 = vpop.permute.xlu2 %1169  ;;  %v1182_v15 = vpop.permute.xlu0 %1181 }
 0x15f   : > { %v1192_v29 = vsel %vm460_vm13, %v1182_v15, %v1188_v28 }
 0x160   : > { %v1196_v30 = vmul.f32 %v2529_v10, %v1192_v29  ;;  %929 = vrot.lane.b32.xlu1 %v2505_v22, %s1848_s23 }
 0x162   : > { %v1264_v33 = vsel %vm346_vm6, %v1196_v30, %v1256_v26  ;;  %v717_v31 = vpop.permute.xlu1 %716 }
 0x163   : > { %1283 = vmatpush.msra.mxu3 %v1264_v33 }
 0x164   : > { %931 = vrot.lane.b32.xlu2 %v2478_v40, %s1848_s23  ;;  %925 = vrot.lane.b32.xlu0 %v2478_v40, %s1846_s12  ;;  %s1469_s12 = sshll.u32 %s1817_s21, 1 }
 0x166   : > { %v1180_v32 = vpop.permute.xlu2 %1179  ;;  %v743_v36 = vpop.permute.xlu0 %742 }
 0x167   : > { %v747_v37 = vsel %vm498_vm11, %v737_v2, %v743_v36 }
 0x168   : > { %v751_v54 = vmul.f32 %v1628_v41, %v747_v37  ;;  %947 = vrot.lane.b32.xlu1 %v2505_v22, %s2771_s22 }
 0x16a   : > { %1462 = vmatpush.msk.msra.mxu1 %vm346_vm6, %v751_v54  ;;  %v725_v38 = vpop.permute.xlu1 %724 }
 0x16b   : > { %v729_v59 = vsel %vm479_vm10, %v719_v7, %v725_v38 }
 0x16c   : > { %901 = vrot.lane.b32.xlu2 %v2505_v22, %s1844_s11  ;;  %941 = vrot.lane.b32.xlu0 %v2505_v22, %s1849_s13  ;;  %v733_v61 = vmul.f32 %v1629_v57, %v729_v59 }
 0x16e   : > { %v1140_v39 = vpop.permute.xlu2 %1139  ;;  %v723_v42 = vpop.permute.xlu0 %722  ;;  %v776_v9 = vrot.slane %v733_v61, 4  ;;  %v1635_v61 = vld [vmem:[#allocation5 + $0x4] ss:$0 sm:$0xff] }
 0x16f   : > { %v728_v53 = vsel %vm479_vm10, %v717_v31, %v723_v42 }
 0x170   : > { %907 = vrot.lane.b32.xlu1 %v2505_v22, %s1845_s7  ;;  %v732_v2 = vmul.f32 %v1629_v57, %v728_v53  ;;  %v1634_v53 = vld [vmem:[#allocation5 + $0x2] ss:$0 sm:$0xff] }
 0x172   : > { %v1168_v49 = vpop.permute.xlu1 %1167  ;;  %v775_v7 = vrot.slane %v732_v2, 4 }
 0x173   : > { %v1173_v14 = vsel %vm441_vm12, %v1162_v16, %v1168_v49 }
 0x174   : > { %909 = vrot.lane.b32.xlu2 %v2478_v40, %s1845_s7  ;;  %903 = vrot.lane.b32.xlu0 %v2478_v40, %s1844_s11  ;;  %v1177_v18 = vmul.f32 %v1630_v35, %v1173_v14  ;;  %v777_v63 = vsel %vm346_vm6, %v775_v7, %v776_v9  ;;  %s2773_s11 = sld [smem:[#allocation12_spill]]  ;;  %s1855_s7 = smov 64  }
 0x176   : > { %v1148_v52 = vpop.permute.xlu2 %1147  ;;  %v1164_v43 = vpop.permute.xlu0 %1163  ;;  %v1249_v29 = vrot.slane %v1177_v18, 4 }
 0x177   : > { %v1174_v11 = vsel %vm441_vm12, %v1164_v43, %v1170_v1  ;;  %v1633_v1 = vld [vmem:[#allocation5 + $0x4] ss:$0 sm:$0xff] }
 0x178   : > { %891 = vrot.lane.b32.xlu1 %v2478_v40, %s1843_s10  ;;  %v1178_v21 = vmul.f32 %v1630_v35, %v1174_v11  ;;  %v1159_v37 = vmul.f32 %v1633_v1, %v2304_v3  ;;  %v679_v35 = vmul.f32 %v1635_v61, %v2191_v62 }
 0x17a   : > { %v741_v56 = vpop.permute.xlu1 %740  ;;  %v1250_v30 = vrot.slane %v1178_v21, 4  ;;  %v782_v14 = vsel %vm346_vm6, %v679_v35, %v768_v55  ;;  %v656_v55 = vmul.f32 %v2444_v13, %v2432_v45  ;;  %s1470_s23 = sshll.u32 %s2773_s11, 2  ;;  %s1727_s11 = scalar_lea.hbm %s2774_s4, 64 }
 0x17b   : > { %s1318_s13 = sadd.s32 %s1470_s23, %s1469_s12 }
 0x17c   : > { %865 = vrot.lane.b32.xlu2 %v2505_v22, %s1838_s18  ;;  %885 = vrot.lane.b32.xlu0 %v2478_v40, %s1842_s9  ;;  %s1471_s15 = sshll.u32 %s1318_s13, 3 }
 0x17d   : > { %s1320_s22 = scalar_lea.hbm %s2774_s4, %s1471_s15 }
 0x17e   : > { %v1130_v19 = vpop.permute.xlu2 %1129  ;;  %v735_v0 = vpop.permute.xlu0 %734  ;;  %s1324_s14 = sshll.u32 %s1320_s22, 4  ;;  %s1325_s14 = int_to_ptr.hbm [resolvable:$true] %s1324_s14 }
 0x17f   : > { %v746_v8 = vsel %vm498_vm11, %v735_v0, %v741_v56 }
 0x180   : > { %v750_v17 = vmul.f32 %v1628_v41, %v746_v8  ;;  %871 = vrot.lane.b32.xlu1 %v2505_v22, %s1841_s8  ;;  %v1632_v41 = vld [vmem:[#allocation5 + $0x3] ss:$0 sm:$0xff] }
 0x182   : > { %800 = vmatpush.msra.mxu1 %v750_v17  ;;  %v707_v26 = vpop.permute.xlu1 %706 }
 0x183   : > { %v711_v16 = vsel %vm460_vm13, %v2499_v25, %v707_v26  ;;  %v1160_v25 = vmul.f32 %v1633_v1, %v2282_v50 }
 0x184   : > { %873 = vrot.lane.b32.xlu2 %v2478_v40, %s1841_s8  ;;  %867 = vrot.lane.b32.xlu0 %v2478_v40, %s1838_s18  ;;  %v715_v6 = vmul.f32 %v1631_v47, %v711_v16  ;;  %s246_s8 = sand.u32 1, %s1797_s16  }
 0x185   : > { %801 = vmatpush.msra.mxu1 %v777_v63  ;;  %v1263_v42 = vsel %vm346_vm6, %v1160_v25, %v1249_v29  ;;  %s1307_s21 = scalar_lea.sflag [#allocation4], %s246_s8 }
 0x186   : > { %v2574_v27 = vpop.permute.xlu2 %1109  ;;  %v1186_v28 = vpop.permute.xlu0 %1185  ;;  %v783_v31 = vsel %vm346_vm6, %v715_v6, %v775_v7 }
 0x187   : > { %v1191_v15 = vsel %vm460_vm13, %v1180_v32, %v1186_v28  ;;  %802 = vmatpush.msra.mxu1 %v783_v31  ;;  %v1251_v32 = vsel %vm346_vm6, %v1249_v29, %v1250_v30 }
 0x188   : > { %v1195_v33 = vmul.f32 %v2529_v10, %v1191_v15  ;;  %889 = vrot.lane.b32.xlu1 %v2505_v22, %s1843_s10  ;;  %v1637_v15 = vld [vmem:[#allocation5] ss:$0 sm:$0xff] }
 0x18a   : > { %1284 = vmatpush.msra.mxu3 %v1195_v33  ;;  %v1146_v36 = vpop.permute.xlu1 %1145 }
 0x18b   : > { %v1151_v10 = vsel %vm418_vm14, %v1140_v39, %v1146_v36 }
 0x18c   : > { %849 = vrot.lane.b32.xlu2 %v2478_v40, %s2772_s6  ;;  %883 = vrot.lane.b32.xlu0 %v2505_v22, %s1842_s9  ;;  %v1155_v38 = vmul.f32 %v1632_v41, %v1151_v10  ;;  %s1443_s9 = sshll.u32 %s246_s8, 4 }
 0x18d   : > { %1285 = vmatpush.msra.mxu3 %v1251_v32  ;;  %s2626_s10 = scalar_lea.vmem [#allocation7], %s1443_s9 }
 0x18e   : > { %v1128_v54 = vpop.permute.xlu2 %1127  ;;  %v1142_v49 = vpop.permute.xlu0 %1141  ;;  %v1242_v43 = vrot.slane %v1155_v38, 4  ;;  %v1638_v38 = vld [vmem:[#allocation5 + $0x7] ss:$0 sm:$0xff]  ;;  %s1322_s27 = sshll.u32 %s2626_s10, 4  ;;  %s1323_s27 = int_to_ptr.vmem [resolvable:$true] %s1322_s27 }
 0x18f   : > { %1286 = vmatpush.msra.mxu3 %v1263_v42  ;;  %v1152_v50 = vsel %vm418_vm14, %v1142_v49, %v1148_v52 }
 0x190   : > { %v1156_v57 = vmul.f32 %v1632_v41, %v1152_v50  ;;  %847 = vrot.lane.b32.xlu1 %v2505_v22, %s2772_s6  ;;  %s1721_s6 = sshra.s32 %s1325_s14, 4  ;;  %s1722_s6 = int_to_ptr.hbm [resolvable:$true] %s1721_s6 }
 0x191   : > { %1287 = vmatpush.msra.mxu3 %v1159_v37  ;;  %s1723_s18 = scalar_lea.hbm %s1722_s6, 16  ;;  %p1728_p7 = scmp.lt.s32.totalorder %s1722_s6, %s2774_s4 }
 0x192   : > { %v1243_v59 = vrot.slane %v1156_v57, 4  ;;  %v1124_v39 = vpop.permute.xlu1 %1123  ;;  %p1724_p2 = scmp.ne.s32.totalorder %s1722_s6, %s1723_s18  ;;  %p1729_p8 = scmp.lt.s32.totalorder %s1727_s11, %s1723_s18 }
 0x193   : > { %v1134_v52 = vsel %vm399_vm9, %v1124_v39, %v1130_v19  ;;  %v785_v19 = vld [vmem:[%s2734_s3] sm:$0xff] }
 0x194   : > { %853 = vrot.lane.b32.xlu2 %v2505_v22, %s1839_s26  ;;  %855 = vrot.lane.b32.xlu0 %v2478_v40, %s1839_s26  ;;  %v1244_v3 = vsel %vm346_vm6, %v1242_v43, %v1243_v59  ;;  %v1138_v2 = vmul.f32 %v1634_v53, %v1134_v52  ;;  %p1725_p3 = pnand %p1724_p2, %p1951_p6  ;;  %p1730_p9 = por %p1729_p8, %p1728_p7 }
 0x195   : > { %1288 = vmatpush.msra.mxu3 %v1244_v3 }
 0x196   : > { %v705_v56 = vpop.permute.xlu0 %704  ;;  %v2599_v0 = vpop.permute.xlu2 %1085  ;;  %v1262_v7 = vsel %vm346_vm6, %v1138_v2, %v1242_v43  ;;  %p1726_p5 = pneg %p1725_p3 }
 0x197   : > { %v710_v8 = vsel %vm460_vm13, %v2434_v5, %v705_v56  ;;  %1289 = vmatpush.msra.mxu3 %v1262_v7  ;;  %v678_v5 = vmul.f32 %v1635_v61, %v2144_v51  ;;  %v1640_v56 = vld [vmem:[#allocation5 + $0x6] ss:$0 sm:$0xff] }
 0x198   : > { %v714_v9 = vmul.f32 %v1631_v47, %v710_v8  ;;  %1269 = vperm.xlu1 %1610, %v785_v19   ;;  %v1636_v47 = vld [vmem:[#allocation5 + $0x1] ss:$0 sm:$0xff]  ;;  %p1731_p12 = pnand %p1730_p9, %p1726_p5 }
 0x19a   : > { %803 = vmatpush.msra.mxu1 %v714_v9  ;;  %v1106_v17 = vpop.permute.xlu1 %1105 }
 0x19c   : > { %1031 = vperm.xlu2 %1608, %v2179_v58   ;;  %804 = vmatpush.msra.mxu1 %v2496_v46 }
 0x19d   : > { %788 = vperm.xlu0 %1609, %v785_v19  }
 0x19e   : > { %805 = vmatpush.msra.mxu1 %v782_v14  ;;  %v1104_v62 = vpop.permute.xlu0 %1103  ;;  %v986_v11 = vpop.permute.xlu2 %985 }
 0x19f   : > { %v1115_v58 = vsel %vm380_vm8, %v1104_v62, %v2574_v27 }
 0x1a0   : > { %806 = vmatpush.msra.mxu1 %v678_v5  ;;  %v1119_v63 = vmul.f32 %v1636_v47, %v1115_v58  ;;  %v1641_v5 = vld [vmem:[#allocation5 + $0x5] ss:$0 sm:$0xff] }
 0x1a2   : > { %v568_v18 = vpop.f32.mrf.mxu0  ;;  %807 = vmatpush.msra.mxu1 %v2473_v34  ;;  %v1122_v48 = vpop.permute.xlu1 %1121  ;;  %v1235_v45 = vrot.slane %v1119_v63, 4 }
 0x1a3   : > { %v569_v51 = vadd.f32 %v568_v18, %v2326_v12  ;;  %v1133_v21 = vsel %vm399_vm9, %v1122_v48, %v1128_v54 }
 0x1a4   : > { %808 = vmatpush.msra.mxu1 %v2455_v24  ;;  %v1137_v34 = vmul.f32 %v1634_v53, %v1133_v21  ;;  %v620_v24 = vmul.f32 %v2405_v60, %v2378_v20 }
 0x1a5   : > { %vm571_vm0 = vcmp.ge.f32.partialorder %v569_v51, 0.0  ;;  %v572_v46 = vmul.f32 0.1, %v569_v51 }
 0x1a6   : > { %809 = vmatpush.msra.mxu1 %v656_v55  ;;  %v1112_v26 = vpop.permute.xlu0 %1111  ;;  %1290 = vmatpush.msra.mxu3 %v1137_v34  ;;  %v966_v6 = vpop.permute.xlu2 %965 }
 0x1a7   : > { %v573_v16 = vsel %vm571_vm0, %v569_v51, %v572_v46  ;;  %v1116_v27 = vsel %vm380_vm8, %v1106_v17, %v1112_v26  ;;  %v1643_v46 = vld [vmem:[#allocation5 + $0x4] ss:$0 sm:$0xff] }
 0x1a8   : > { %575 = vst.msk [vmem:[%s2626_s10] sm:$0xff] %vm574_vm1, %v573_v16  ;;  %v1120_v12 = vmul.f32 %v1636_v47, %v1116_v27  ;;  %810 = vmatpush.msra.mxu1 %v2423_v23  ;;  %v922_v16 = vmul.f32 %v1643_v46, %v2478_v40  ;;  %v1642_v27 = vld [vmem:[#allocation5 + $0x3] ss:$0 sm:$0xff] }
 0x1aa   : > { %v1236_v13 = vrot.slane %v1120_v12, 4  ;;  %811 = vmatpush.msra.mxu1 %v2426_v44  ;;  %v1094_v1 = vpop.permute.xlu1 %1093  ;;  %v1639_v44 = vld [vmem:[#allocation5 + $0x8] ss:$0 sm:$0xff] }
 0x1ac   : > { %812 = vmatpush.msra.mxu1 %v620_v24  ;;  %v1237_v28 = vsel %vm346_vm6, %v1235_v45, %v1236_v13 }
 0x1ad   : > { %1463 = vmatmul.msk.f32.vlgmr.msra.gmra.mxu1 %vm544_vm15, %v2416_v4  ;;  %1291 = vmatpush.msra.mxu3 %v1237_v28 }
 0x1ae   : > { %v1088_v29 = vpop.permute.xlu0 %1087  ;;  %v984_v20 = vpop.permute.xlu2 %983 }
 0x1af   : > { %v1098_v23 = vsel %vm361_vm7, %v1088_v29, %v1094_v1 }
 0x1b0   : > { %v1102_v30 = vmul.f32 %v1637_v15, %v1098_v23 }
 0x1b2   : > { %v1261_v33 = vsel %vm346_vm6, %v1102_v30, %v1235_v45  ;;  %v980_v31 = vpop.permute.xlu1 %979  ;;  %v921_v45 = vmul.f32 %v1643_v46, %v2505_v22 }
 0x1b3   : > { %1292 = vmatpush.msra.mxu3 %v1261_v33  ;;  %v990_v60 = vsel %vm498_vm11, %v980_v31, %v986_v11  ;;  %v1644_v33 = vld [vmem:[#allocation5 + $0x2] ss:$0 sm:$0xff] }
 0x1b4   : > { %v994_v25 = vmul.f32 %v1639_v44, %v990_v60 }
 0x1b6   : > { %v1092_v41 = vpop.permute.xlu0 %1091  ;;  %1464 = vmatpush.msk.msra.mxu2 %vm346_vm6, %v994_v25  ;;  %v924_v54 = vpop.permute.xlu2 %923 }
 0x1b7   : > { %v1097_v32 = vsel %vm361_vm7, %v2599_v0, %v1092_v41 }
 0x1b8   : > { %v1101_v36 = vmul.f32 %v1637_v15, %v1097_v32  ;;  %v1645_v32 = vld [vmem:[#allocation5 + $0x1] ss:$0 sm:$0xff] }
 0x1ba   : > { %1293 = vmatpush.msra.mxu3 %v1101_v36  ;;  %v962_v10 = vpop.permute.xlu1 %961 }
 0x1bb   : > { %1467 = vmatmul.msk.f32.vlgmr.msra.gmra.mxu3 %vm544_vm15, %v2416_v4 }
 0x1be   : > { %v960_v37 = vpop.permute.xlu0 %959  ;;  %v932_v52 = vpop.permute.xlu2 %931 }
 0x1bf   : > { %v971_v42 = vsel %vm479_vm10, %v960_v37, %v966_v6 }
 0x1c0   : > { %v975_v49 = vmul.f32 %v1638_v38, %v971_v42 }
 0x1c2   : > { %v978_v50 = vpop.permute.xlu1 %977  ;;  %v1018_v3 = vrot.slane %v975_v49, 4 }
 0x1c3   : > { %v989_v43 = vsel %vm498_vm11, %v978_v50, %v984_v20 }
 0x1c4   : > { %v993_v59 = vmul.f32 %v1639_v44, %v989_v43 }
 0x1c6   : > { %v968_v57 = vpop.permute.xlu0 %967  ;;  %1043 = vmatpush.msra.mxu2 %v993_v59  ;;  %v902_v19 = vpop.permute.xlu2 %901 }
 0x1c7   : > { %v972_v53 = vsel %vm479_vm10, %v962_v10, %v968_v57 }
 0x1c8   : > { %v976_v39 = vmul.f32 %v1638_v38, %v972_v53 }
 0x1ca   : > { %v1019_v61 = vrot.slane %v976_v39, 4  ;;  %v950_v2 = vpop.permute.xlu1 %949  ;;  %v1646_v39 = vld [vmem:[#allocation5] ss:$0 sm:$0xff] }
 0x1cc   : > { %v1020_v0 = vsel %vm346_vm6, %v1018_v3, %v1019_v61 }
 0x1cd   : > { %1044 = vmatpush.msra.mxu2 %v1020_v0 }
 0x1ce   : > { %v944_v8 = vpop.permute.xlu0 %943  ;;  %v910_v51 = vpop.permute.xlu2 %909 }
 0x1cf   : > { %v954_v9 = vsel %vm460_vm13, %v944_v8, %v950_v2 }
 0x1d0   : > { %v958_v7 = vmul.f32 %v1640_v56, %v954_v9 }
 0x1d2   : > { %v1026_v35 = vsel %vm346_vm6, %v958_v7, %v1018_v3  ;;  %v930_v17 = vpop.permute.xlu1 %929 }
 0x1d3   : > { %1045 = vmatpush.msra.mxu2 %v1026_v35  ;;  %v935_v14 = vsel %vm441_vm12, %v924_v54, %v930_v17 }
 0x1d4   : > { %v939_v47 = vmul.f32 %v1641_v5, %v935_v14 }
 0x1d6   : > { %v926_v62 = vpop.permute.xlu0 %925  ;;  %v1011_v48 = vrot.slane %v939_v47, 4  ;;  %v866_v1 = vpop.permute.xlu2 %865 }
 0x1d7   : > { %v936_v11 = vsel %vm441_vm12, %v926_v62, %v932_v52 }
 0x1d8   : > { %v940_v18 = vmul.f32 %v1641_v5, %v936_v11  ;;  %v1025_v24 = vsel %vm346_vm6, %v922_v16, %v1011_v48 }
 0x1da   : > { %v948_v58 = vpop.permute.xlu1 %947  ;;  %v1012_v55 = vrot.slane %v940_v18, 4 }
 0x1dc   : > { %v1013_v34 = vsel %vm346_vm6, %v1011_v48, %v1012_v55 }
 0x1de   : > { %v942_v21 = vpop.permute.xlu0 %941  ;;  %v874_v60 = vpop.permute.xlu2 %873 }
 0x1df   : > { %v953_v63 = vsel %vm460_vm13, %v942_v21, %v948_v58 }
 0x1e0   : > { %v957_v26 = vmul.f32 %v1640_v56, %v953_v63 }
 0x1e2   : > { %1046 = vmatpush.msra.mxu2 %v957_v26  ;;  %v908_v12 = vpop.permute.xlu1 %907 }
 0x1e3   : > { %v913_v13 = vsel %vm418_vm14, %v902_v19, %v908_v12 }
 0x1e4   : > { %1047 = vmatpush.msra.mxu2 %v1013_v34  ;;  %v917_v6 = vmul.f32 %v1642_v27, %v913_v13 }
 0x1e6   : > { %1048 = vmatpush.msra.mxu2 %v1025_v24  ;;  %v904_v28 = vpop.permute.xlu0 %903  ;;  %v1004_v29 = vrot.slane %v917_v6, 4  ;;  %v850_v42 = vpop.permute.xlu2 %849 }
 0x1e7   : > { %v914_v15 = vsel %vm418_vm14, %v904_v28, %v910_v51 }
 0x1e8   : > { %v918_v23 = vmul.f32 %v1642_v27, %v914_v15  ;;  %1049 = vmatpush.msra.mxu2 %v921_v45 }
 0x1ea   : > { %v1005_v40 = vrot.slane %v918_v23, 4  ;;  %v892_v30 = vpop.permute.xlu1 %891 }
 0x1ec   : > { %v1006_v44 = vsel %vm346_vm6, %v1004_v29, %v1005_v40 }
 0x1ed   : > { %1050 = vmatpush.msra.mxu2 %v1006_v44 }
 0x1ee   : > { %v886_v22 = vpop.permute.xlu0 %885  ;;  %v854_v61 = vpop.permute.xlu2 %853 }
 0x1ef   : > { %v896_v31 = vsel %vm399_vm9, %v886_v22, %v892_v30 }
 0x1f0   : > { %v900_v20 = vmul.f32 %v1644_v33, %v896_v31 }
 0x1f2   : > { %v1024_v41 = vsel %vm346_vm6, %v900_v20, %v1004_v29  ;;  %v872_v25 = vpop.permute.xlu1 %871 }
 0x1f3   : > { %1051 = vmatpush.msra.mxu2 %v1024_v41  ;;  %v877_v36 = vsel %vm380_vm8, %v866_v1, %v872_v25 }
 0x1f4   : > { %v881_v54 = vmul.f32 %v1645_v32, %v877_v36 }
 0x1f6   : > { %v868_v10 = vpop.permute.xlu0 %867  ;;  %v997_v50 = vrot.slane %v881_v54, 4 }
 0x1f7   : > { %v878_v37 = vsel %vm380_vm8, %v868_v10, %v874_v60 }
 0x1f8   : > { %v882_v38 = vmul.f32 %v1645_v32, %v878_v37 }
 0x1fa   : > { %v890_v49 = vpop.permute.xlu1 %889  ;;  %v998_v43 = vrot.slane %v882_v38, 4 }
 0x1fc   : > { %v999_v3 = vsel %vm346_vm6, %v997_v50, %v998_v43 }
 0x1fe   : > { %v884_v57 = vpop.permute.xlu0 %883 }
 0x1ff   : > { %v895_v59 = vsel %vm399_vm9, %v884_v57, %v890_v49 }
 0x200   : > { %v899_v53 = vmul.f32 %v1644_v33, %v895_v59 }
 0x202   : > { %1052 = vmatpush.msra.mxu2 %v899_v53  ;;  %v848_v52 = vpop.permute.xlu1 %847 }
 0x203   : > { %v859_v56 = vsel %vm361_vm7, %v848_v52, %v854_v61 }
 0x204   : > { %1053 = vmatpush.msra.mxu2 %v999_v3  ;;  %v863_v9 = vmul.f32 %v1646_v39, %v859_v56 }
 0x206   : > { %v856_v2 = vpop.permute.xlu0 %855 }
 0x207   : > { %v860_v0 = vsel %vm361_vm7, %v850_v42, %v856_v2 }
 0x208   : > { %v864_v8 = vmul.f32 %v1646_v39, %v860_v0 }
 0x20a   : > { %v1023_v7 = vsel %vm346_vm6, %v864_v8, %v997_v50  ;;  %v1270_v62 = vpop.permute.xlu1 %1269 }
 0x20b   : > { %1054 = vmatpush.msra.mxu2 %v1023_v7 }
 0x20d   : > { %1055 = vmatpush.msra.mxu2 %v863_v9 }
 0x20e   : > { %1465 = vmatmul.msk.f32.vlgmr.msra.gmra.mxu2 %vm544_vm15, %v2416_v4  ;;  %v1032_v4 = vpop.permute.xlu2 %1031 }
 0x20f   : > { %v789_v35 = vpop.permute.xlu0 %788 }
 0x22a   : > { %v814_v19 = vpop.f32.mrf.mxu1 }
 0x22b   : > { %v815_v17 = vadd.f32 %v814_v19, %v789_v35 }
 0x22d   : > { %v818_v5 = vmul.f32 0.1, %v815_v17  ;;  %vm817_vm2 = vcmp.ge.f32.partialorder %v815_v17, 0.0 }
 0x22f   : > { %v819_v14 = vsel %vm817_vm2, %v815_v17, %v818_v5 }
 0x230   : > { %821 = vrot.lane.b32.xlu1 %v819_v14, %s1855_s7 }
 0x23e   : > { %v1295_v11 = vpop.f32.mrf.mxu3 }
 0x23f   : > { %v1296_v47 = vadd.f32 %v1295_v11, %v1270_v62 }
 0x241   : > { %v1299_v18 = vmul.f32 0.1, %v1296_v47  ;;  %vm1298_vm3 = vcmp.ge.f32.partialorder %v1296_v47, 0.0 }
 0x243   : > { %v1300_v58 = vsel %vm1298_vm3, %v1296_v47, %v1299_v18 }
 0x244   : > { %1302 = vrot.lane.b32.xlu2 %v1300_v58, %s1855_s7 }
 0x291   : > { %v1057_v51 = vpop.f32.mrf.mxu2 }
 0x292   : > { %v1058_v48 = vadd.f32 %v1057_v51, %v1032_v4 }
 0x294   : > { %vm1060_vm4 = vcmp.ge.f32.partialorder %v1058_v48, 0.0  ;;  %v1061_v55 = vmul.f32 0.1, %v1058_v48 }
 0x296   : > { %v1062_v46 = vsel %vm1060_vm4, %v1058_v48, %v1061_v55 }
 0x297   : > { %1063 = vst.msk [vmem:[%s2626_s10 + $0x8] sm:$0xff] %vm574_vm1, %v1062_v46 }
 0x29e   : > { %v1303_v21 = vpop.permute.xlu2 %1302 }
 0x29f   : > { %1305 = vst.msk [vmem:[%s2626_s10 + $0x8] sm:$0xff] %vm824_vm5, %v1303_v21 }
 0x2a2   : > { %v822_v63 = vpop.permute.xlu1 %821 }
 0x2a3   : > { %825 = vst.msk [vmem:[%s2626_s10] sm:$0xff] %vm824_vm5, %v822_v63 }
 0x2a4   : > { %1734 = shalt.err (!%p1731_p12)
}
 0x2a5   : > { %1481 = dma.vmem_to_hbm [thread:$0]  (%p1951_p6), %s1323_s27, 256, %s1325_s14, %s1307_s21  }
 0x2a6 PF: > { %s2776_s8 = sld [smem:[#allocation11_spill]]  ;;  %p1498_p13 = scmp.ge.s32.totalorder %s1833_s25, 2 }
 0x2a8   : > { %p1492_p4 = pnand %p1498_p13, %p1957_p10 }
 0x2aa   : > { %p1493_p11 = pneg %p1492_p4 }
 0x2ac   : > { %s1336_s23 = sand.u32 1, %s2776_s8  }
 0x2ad   : > { %s1337_s13 = scalar_lea.sflag [#allocation4], %s1336_s23 }
 0x2ae   : > { %1788 = dma.done.wait (%p1493_p11), %s1337_s13, 256  }
 0x2af   : > { %1790 = vsyncadd (%p1493_p11), %s1337_s13, 4294967040  ;;  %s21_s25 = sadd.s32 1, %s1833_s25   ;;  %s2778_s21 = sld [smem:[#allocation13_spill]] }
 0x2b0   : > { %p18_p1 = scmp.ge.s32.totalorder %s21_s25, 6   ;;  %s2779_s23 = sld [smem:[#allocation16_spill]] }
 0x2b1   : > { %s2780_s28 = sld [smem:[#allocation17_spill]]  ;;  %s2781_s15 = smov %s1797_s16 }
 0x2b2   : > { %s2782_s16 = smov %s1801_s17  ;;  %s2783_s17 = smov %s2002_s5 }
 0x2b3   : > { %s2784_s18 = smov %s1809_s19  ;;  %s2785_s19 = smov %s1813_s20 }
 0x2b4   : > { %s2786_s20 = smov %s1999_s2  ;;  %s2787_s22 = smov %s1829_s24 }
 0x2b5   :  { %20 = sbr.rel (!%p18_p1) target bundleno = 13 (0xd), region = 91 }
 0x2b7   : > { %s2788_s24 = smov %s2780_s28 }
 0x2ba   :  { %1343 = vsyncpa [#allocation3], 1 }
 0x2bb   :  { %1345 = vsyncpa [#allocation3 + $0x1], 1 }
 0x2bc   :  { %1346 = vsyncpa [#allocation6], 1 }
 0x2bd   :  { %1347 = vsyncpa [#allocation4], 1 }
 0x2be   :  { %1349 = vsyncpa [#allocation4 + $0x1], 1 }

</bundles_post_ra>
